<compile_context>
chip_gen: v6e
topology: v6e:2x2x1
jax: 0.10.0
libtpu: 0.0.40
codegen_flags: <defaults>
</compile_context>

<pallas_src>
import functools

import numpy as np
import jax
import jax.numpy as jnp
from jax.experimental import pallas as pl
from jax.experimental.pallas import tpu as pltpu

# ---- hyper-parameters (the reference module leaves TILE_IN_F / QUALITY_LEVELS global) ----
TILE_IN_F = 4
QUALITY_LEVELS = 4
EMBED_DIM = 32            # small embed_dim for the example (module default is 128)
NEG_SLOPE = 0.01          # nn.LeakyReLU default
LN_EPS = 1e-5             # nn.LayerNorm default

FOV_LEN = 50                                   # spatial length of fov / distance convs
L1 = (FOV_LEN + 2 * 1 - 4) // 2 + 1            # 25  (Conv1d k=4, s=2, p=1)
L2 = (L1 + 2 * 1 - 4) // 2 + 1                 # 12
N_SMALL = (1 + TILE_IN_F) + TILE_IN_F * QUALITY_LEVELS + 1     # 22


def _round_up(x, m):
    return ((x + m - 1) // m) * m


# lane-dense packing of the bandwidth-conv im2col patches: PACK consecutive
# sequence positions share one 128-lane output row (PACK copies of the [9, E]
# conv weight on a block diagonal).
PACK = (128 // EMBED_DIM) if (EMBED_DIM <= 128 and 128 % EMBED_DIM == 0) else 1
PE = PACK * EMBED_DIM                           # lanes of the packed conv output
KDIM = 9 * PACK                                 # real im2col columns per packed row
KDIM_PAD = _round_up(KDIM, 8)                   # zero-padded to a sublane multiple
SMALL_ROW0 = _round_up(KDIM_PAD, 16)            # w_small row offset in the w_misc slab
SEQ_MULT = 16 * PACK                            # seq padding so s_rows is a full bf16 tile

# 128-lane-aligned offsets of the three small activations inside one packed vector
FOV_OFF = 0
DIST_OFF = _round_up(FOV_LEN * TILE_IN_F, 128)                 # 256
SMALL_OFF = DIST_OFF + _round_up(FOV_LEN * TILE_IN_F, 128)     # 512
VEC_W = SMALL_OFF + N_SMALL                                    # 534


# --------------------------------------------------------------------------------
# Parameter initialisation (kaiming-normal like the module; biases / LN affine are
# lightly randomised to exercise the kernel's bias paths).
# --------------------------------------------------------------------------------
def _kaiming(key, shape, fan_out):
    gain = np.sqrt(2.0 / (1.0 + NEG_SLOPE ** 2))
    std = gain / np.sqrt(fan_out)
    return jax.random.normal(key, shape, dtype=jnp.float32) * std


def init_params(key):
    E, T, Q = EMBED_DIM, TILE_IN_F, QUALITY_LEVELS
    H = E // 2
    ks = jax.random.split(key, 20)

    def bias(k, n):
        return 0.1 * jax.random.normal(k, (n,), jnp.float32)

    p = {}
    # Conv1d weights in PyTorch layout [cout, cin, k]
    p["bw_w"] = _kaiming(ks[0], (E, 3, 3), E * 3);       p["bw_b"] = bias(ks[9], E)
    p["fov_w1"] = _kaiming(ks[1], (H, T, 4), H * 4);     p["fov_b1"] = bias(ks[10], H)
    p["fov_w2"] = _kaiming(ks[2], (E, H, 4), E * 4);     p["fov_b2"] = bias(ks[11], E)
    p["dist_w1"] = _kaiming(ks[3], (H, T, 4), H * 4);    p["dist_b1"] = bias(ks[12], H)
    p["dist_w2"] = _kaiming(ks[4], (E, H, 4), E * 4);    p["dist_b2"] = bias(ks[13], E)
    # Linear weights in PyTorch layout [out, in]
    p["buf_w"] = _kaiming(ks[5], (E, 1 + T), E);         p["buf_b"] = bias(ks[14], E)
    p["gof_w"] = _kaiming(ks[6], (E, T * Q), E);         p["gof_b"] = bias(ks[15], E)
    p["fr_w"] = _kaiming(ks[7], (E, 1), E);              p["fr_b"] = bias(ks[16], E)
    p["out_w"] = _kaiming(ks[8], (E, 6 * E), E);         p["out_b"] = bias(ks[17], E)
    p["ln_g"] = 1.0 + 0.1 * jax.random.normal(ks[18], (E,), jnp.float32)
    p["ln_b"] = 0.1 * jax.random.normal(ks[19], (E,), jnp.float32)
    return p


# --------------------------------------------------------------------------------
# Glue: replicate the PyTorch forward's slicing / padding of `state`
# --------------------------------------------------------------------------------
def _slice_state(state):
    """Returns (bw [B,3,S] NCW, fov [B,T,50], buf [B,1+T], gof [B,T*Q],
    frame [B,1], dist [B,T,50]) exactly as the module's forward builds them."""
    B, S, F = state.shape
    T, Q = TILE_IN_F, QUALITY_LEVELS
    dt = state.dtype

    bw_dim = min(3, F)
    bw = jnp.transpose(state[:, :, :bw_dim], (0, 2, 1))
    if bw_dim < 3:
        bw = jnp.concatenate([bw, jnp.zeros((B, 3 - bw_dim, S), dt)], axis=1)

    last = state[:, -1, :]

    fov_start = bw_dim
    fov_len = FOV_LEN * T
    fov_end = min(fov_start + fov_len, F)
    if fov_end > fov_start:
        fov_flat = last[:, fov_start:fov_end]
        if fov_flat.shape[1] < fov_len:
            fov_flat = jnp.concatenate(
                [fov_flat, jnp.zeros((B, fov_len - fov_flat.shape[1]), dt)], axis=1)
    else:
        fov_flat = jnp.zeros((B, fov_len), dt)
    fov = fov_flat.reshape(B, T, FOV_LEN)

    buf_start = fov_end
    buf_size = (last[:, buf_start:buf_start + 1] if buf_start < F
                else jnp.zeros((B, 1), dt))
    bs_start = buf_start + 1
    bs_end = min(bs_start + T, F)
    if bs_end > bs_start:
        bstate = last[:, bs_start:bs_end]
        if bstate.shape[1] < T:
            bstate = jnp.concatenate(
                [bstate, jnp.zeros((B, T - bstate.shape[1]), dt)], axis=1)
    else:
        bstate = jnp.zeros((B, T), dt)
    buf = jnp.concatenate([buf_size, bstate], axis=1)

    gof_start = bs_end
    gof_dim = T * Q
    gof_end = min(gof_start + gof_dim, F)
    if gof_end > gof_start:
        gof = last[:, gof_start:gof_end]
        if gof.shape[1] < gof_dim:
            gof = jnp.concatenate(
                [gof, jnp.zeros((B, gof_dim - gof.shape[1]), dt)], axis=1)
    else:
        gof = jnp.zeros((B, gof_dim), dt)

    fc_idx = gof_end
    frame = (last[:, fc_idx:fc_idx + 1] if fc_idx < F
             else jnp.zeros((B, 1), dt))

    dist_start = fc_idx + 1
    dist_len = FOV_LEN * T
    dist_end = min(dist_start + dist_len, F)
    if dist_end > dist_start:
        dist_flat = last[:, dist_start:dist_end]
        if dist_flat.shape[1] < dist_len:
            dist_flat = jnp.concatenate(
                [dist_flat, jnp.ones((B, dist_len - dist_flat.shape[1]), dt)], axis=1)
    else:
        dist_flat = jnp.ones((B, dist_len), dt)
    dist = dist_flat.reshape(B, T, FOV_LEN)

    return bw, fov, buf, gof, frame, dist


def prepare_inputs(state):
    """Kernel-layout inputs: lane-densely packed bf16 im2col patches and one
    lane-aligned bf16 vector holding fov | dist | (buf,gof,frame)."""
    B, S, _ = state.shape
    T = TILE_IN_F
    bf16 = jnp.bfloat16
    bw, fov, buf, gof, frame, dist = _slice_state(state.astype(jnp.float32))

    # im2col for Conv1d(3->E, k=3, pad=1): patches[b, l, k*3 + c] = bw[b, c, l+k-1]
    bw_cl = jnp.transpose(bw, (0, 2, 1))                        # [B, S, 3] channel-last
    bw_zp = jnp.pad(bw_cl, ((0, 0), (1, 1), (0, 0)))            # zero-pad seq ends
    patches = jnp.concatenate([bw_zp[:, k:k + S, :] for k in range(3)], axis=-1)

    # pack PACK consecutive positions per row; positions >= S stay EXACTLY zero
    # (the kernel's seq-mean bias correction relies on that invariant)
    pos_total = _round_up(S, SEQ_MULT)
    patches = jnp.pad(patches, ((0, 0), (0, pos_total - S), (0, 0)))
    s_rows = pos_total // PACK
    x_bw = patches.reshape(B, s_rows, KDIM)
    if KDIM_PAD != KDIM:
        x_bw = jnp.pad(x_bw, ((0, 0), (0, 0), (0, KDIM_PAD - KDIM)))
    x_bw = x_bw.astype(bf16)                                    # bf16 from the wrapper

    # position-major flats (match the position-major Toeplitz weights) + the
    # small branch, packed into ONE lane-aligned vector (offsets 0 / 256 / 512)
    x_fov = jnp.transpose(fov, (0, 2, 1)).reshape(B, FOV_LEN * T)
    x_dist = jnp.transpose(dist, (0, 2, 1)).reshape(B, FOV_LEN * T)
    x_small = jnp.concatenate([buf, gof, frame], axis=1)        # [B, 22]
    gap1 = jnp.zeros((B, DIST_OFF - FOV_LEN * T), jnp.float32)
    gap2 = jnp.zeros((B, SMALL_OFF - DIST_OFF - FOV_LEN * T), jnp.float32)
    x_vec = jnp.concatenate([x_fov, gap1, x_dist, gap2, x_small], axis=1).astype(bf16)
    return x_bw, x_vec


# --------------------------------------------------------------------------------
# Host-side weight preparation (run ONCE per parameter set)
# --------------------------------------------------------------------------------
def conv1d_toeplitz_pm(w, lin, stride, pad):
    """Conv1d weight [cout, cin, k] -> position-major Toeplitz matrix
    M[li*cin + ci, lo*cout + co] so flat_out = flat_in @ M (zero padding folded in)."""
    w = np.asarray(w, np.float32)
    cout, cin, k = w.shape
    lout = (lin + 2 * pad - k) // stride + 1
    M = np.zeros((lin * cin, lout * cout), np.float32)
    for co in range(cout):
        for lo in range(lout):
            for kk in range(k):
                li = lo * stride + kk - pad
                if 0 <= li < lin:
                    M[li * cin:(li + 1) * cin, lo * cout + co] += w[co, :, kk]
    return M, lout


def build_kernel_weights(params):
    E, T, Q = EMBED_DIM, TILE_IN_F, QUALITY_LEVELS

    # bandwidth conv: raw [9, E] im2col weight replicated PACK times on a block
    # diagonal -> [KDIM_PAD, PE] so the conv output fills 128 lanes per row
    w9 = np.transpose(np.asarray(params["bw_w"], np.float32), (2, 1, 0)).reshape(9, E)
    w_bw = np.zeros((KDIM_PAD, PE), np.float32)
    for g in range(PACK):
        w_bw[9 * g:9 * (g + 1), E * g:E * (g + 1)] = w9

    wf1, l1 = conv1d_toeplitz_pm(params["fov_w1"], FOV_LEN, 2, 1)
    wf2, l2 = conv1d_toeplitz_pm(params["fov_w2"], l1, 2, 1)
    wd1, _ = conv1d_toeplitz_pm(params["dist_w1"], FOV_LEN, 2, 1)
    wd2, _ = conv1d_toeplitz_pm(params["dist_w2"], l1, 2, 1)
    assert l1 == L1 and l2 == L2
    w_fd1 = np.stack([wf1, wd1])                       # [2, 50*T, L1*H]
    w_fd2 = np.stack([wf2, wd2])                       # [2, L1*H, L2*E]

    # fused block-diagonal linear for buffer / gof / frame branches
    w_small = np.zeros((N_SMALL, 3 * E), np.float32)
    w_small[0:1 + T, 0:E] = np.asarray(params["buf_w"]).T
    w_small[1 + T:1 + T + T * Q, E:2 * E] = np.asarray(params["gof_w"]).T
    w_small[1 + T + T * Q:, 2 * E:3 * E] = np.asarray(params["fr_w"]).T

    # w_bw + w_small share one slab (fewer operands / per-step DMAs)
    misc_w = _round_up(max(PE, 3 * E), 128)
    misc_r = SMALL_ROW0 + _round_up(N_SMALL, 16)
    w_misc = np.zeros((misc_r, misc_w), np.float32)
    w_misc[0:KDIM_PAD, 0:PE] = w_bw
    w_misc[SMALL_ROW0:SMALL_ROW0 + N_SMALL, 0:3 * E] = w_small

    # output Linear(6E->E) with the branch mean-pools / PACK-group reduction
    # folded into its rows (pooling is linear and precedes the Linear):
    #   rows [0:PE)            bandwidth block tiled over the PACK lane groups
    #   rows [PE:PE+L2*E)      fov block tiled over the L2 positions, / L2
    #   rows [..:..+3E)        buffer / gof / frame blocks
    #   rows [..:..+L2*E)      distance block tiled over the L2 positions, / L2
    wo = np.asarray(params["out_w"], np.float32).T     # [6E, E]
    w_out = np.concatenate([
        np.tile(wo[0:E], (PACK, 1)),
        np.tile(wo[E:2 * E], (L2, 1)) / L2,
        wo[2 * E:5 * E],
        np.tile(wo[5 * E:6 * E], (L2, 1)) / L2,
    ], axis=0)

    # one packed f32 slab for every bias + LayerNorm affine (one DMA, static views)
    rows = [
        np.tile(np.asarray(params["bw_b"]), PACK),                    # 0: [PE]
        np.tile(np.asarray(params["fov_b1"]), L1),                    # 1: [L1*H]
        np.tile(np.asarray(params["fov_b2"]), L2),                    # 2: [L2*E]
        np.tile(np.asarray(params["dist_b1"]), L1),                   # 3: [L1*H]
        np.tile(np.asarray(params["dist_b2"]), L2),                   # 4: [L2*E]
        np.concatenate([np.asarray(params["buf_b"]),
                        np.asarray(params["gof_b"]),
                        np.asarray(params["fr_b"])]),                 # 5: [3E]
        np.asarray(params["out_b"]),                                  # 6: [E]
        np.asarray(params["ln_g"]),                                   # 7: [E]
        np.asarray(params["ln_b"]),                                   # 8: [E]
    ]
    width = _round_up(max(r.shape[0] for r in rows), 128)
    slab = np.zeros((len(rows), width), np.float32)
    for i, r in enumerate(rows):
        slab[i, :r.shape[0]] = r

    bf16 = jnp.bfloat16
    return dict(
        w_misc=jnp.asarray(w_misc, bf16),
        w_fd1=jnp.asarray(w_fd1, bf16),
        w_fd2=jnp.asarray(w_fd2, bf16),
        w_out=jnp.asarray(w_out, bf16),
        bias=jnp.asarray(slab, jnp.float32),
    )


# --------------------------------------------------------------------------------
# The Pallas kernel: all six branch encoders + fused output Linear + LayerNorm
# --------------------------------------------------------------------------------
def _encoder_kernel(x_bw_ref, x_vec_ref, w_misc_ref, w_fd1_ref, w_fd2_ref,
                    w_out_ref, bias_ref, out_ref, *, seq_len):
    f32, bf16 = jnp.float32, jnp.bfloat16
    E = EMBED_DIM
    tile_b, s_rows, kdim = x_bw_ref.shape
    l1h = w_fd1_ref.shape[2]              # L1 * (E // 2)
    l2e = w_fd2_ref.shape[2]              # L2 * E

    def leaky(x):
        return jnp.where(x >= 0, x, NEG_SLOPE * x)

    def mm(a, b):
        return jnp.dot(a, b, preferred_element_type=f32)

    # packed bias / affine rows (static views into one f32 slab)
    b_bw = bias_ref[0:1, :PE]
    b_f1, b_f2 = bias_ref[1:2, :l1h], bias_ref[2:3, :l2e]
    b_d1, b_d2 = bias_ref[3:4, :l1h], bias_ref[4:5, :l2e]
    b_sm, b_out = bias_ref[5:6, :3 * E], bias_ref[6:7, :E]
    gamma, beta = bias_ref[7:8, :E], bias_ref[8:9, :E]

    # packed small-weight slab views
    w_bw = w_misc_ref[0:kdim, 0:PE]                               # block-diag im2col conv
    w_small = w_misc_ref[SMALL_ROW0:SMALL_ROW0 + N_SMALL, 0:3 * E]

    # output-Linear row blocks (mean-pools already folded in on the host)
    r1, r2, r3 = PE, PE + l2e, PE + l2e + 3 * E
    wo_bw, wo_fov = w_out_ref[0:r1, :], w_out_ref[r1:r2, :]
    wo_small, wo_dist = w_out_ref[r2:r3, :], w_out_ref[r3:r3 + l2e, :]

    # ---- bandwidth branch: lane-dense packed im2col conv + LeakyReLU + seq sum;
    #      the PACK-group reduction, 1/S scale and the Linear's bw block are the
    #      wo_bw matmul (all reductions on the otherwise idle MXU).
    xb = x_bw_ref[...].reshape(tile_b * s_rows, kdim)             # bf16, no cast needed
    h = mm(xb, w_bw).reshape(tile_b, s_rows, PE)
    h = leaky(h + b_bw)
    acc = jnp.sum(h, axis=1) * (1.0 / seq_len)                    # (tile_b, PE) f32
    z = mm(acc.astype(bf16), wo_bw)                               # (tile_b, E)
    n_pad = s_rows * PACK - seq_len      # zero-padded positions contributed leaky(bias)
    if n_pad:
        corr = mm(leaky(bias_ref[0:1, :E]).astype(bf16), w_out_ref[0:E, :])
        z = z - (float(n_pad) / seq_len) * corr

    # ---- fov / distance branches: 2x position-major Toeplitz conv + LeakyReLU;
    #      the position mean-pool lives in wo_fov / wo_dist (no unaligned lane
    #      slice-add loops, no concat relayout).
    def conv_branch(x, idx, b1, b2):
        h1 = leaky(mm(x, w_fd1_ref[idx]) + b1)                    # (tile_b, L1*H)
        return leaky(mm(h1.astype(bf16), w_fd2_ref[idx]) + b2)    # (tile_b, L2*E)

    h_fov = conv_branch(x_vec_ref[:, FOV_OFF:FOV_OFF + FOV_LEN * TILE_IN_F], 0, b_f1, b_f2)
    h_dist = conv_branch(x_vec_ref[:, DIST_OFF:DIST_OFF + FOV_LEN * TILE_IN_F], 1, b_d1, b_d2)
    z = z + mm(h_fov.astype(bf16), wo_fov)
    z = z + mm(h_dist.astype(bf16), wo_dist)

    # ---- buffer / gof-size / frame-counter: one fused block-diagonal linear
    e_small = leaky(mm(x_vec_ref[:, SMALL_OFF:SMALL_OFF + N_SMALL], w_small) + b_sm)
    z = z + mm(e_small.astype(bf16), wo_small)

    # ---- output bias + LayerNorm
    z = z + b_out
    mu = jnp.mean(z, axis=-1, keepdims=True)
    var = jnp.mean((z - mu) ** 2, axis=-1, keepdims=True)
    zn = (z - mu) * jax.lax.rsqrt(var + LN_EPS)
    # TODO(synk): with embed_dim=32 this final store is a masked 32-lane vst;
    # it is lane-dense at the module default embed_dim=128.
    out_ref[...] = (zn * gamma + beta).astype(out_ref.dtype)


# --------------------------------------------------------------------------------
# Device-aware tiling + wrapper
# --------------------------------------------------------------------------------
def _tpu_vmem_bytes():
    try:
        return int(pltpu.get_tpu_info().vmem_capacity_bytes)
    except Exception:
        return 64 * 1024 * 1024          # conservative default (v7x per-TensorCore)


def _choose_tiling(batch, s_rows):
    """Batch tile sized from the physical VMEM (v7x 64 MiB, v5e/v6e 128 MiB) and
    the x_bw block footprint, with >= 2 grid steps so v7x megacore shards batch."""
    phys = _tpu_vmem_bytes()
    budget = max(4 << 20, min(24 << 20, phys // 4))
    # per batch row: bf16 x_bw block (lane-padded, double-buffered) + f32 conv activation
    per_row = s_rows * 128 * (2 * 2 + 4)
    cap = max(8, min(256, ((budget // per_row) // 8) * 8))
    tile_b = int(min(cap, max(8, _round_up((batch + 1) // 2, 8))))
    padded_b = _round_up(max(batch, tile_b), tile_b)
    if padded_b // tile_b < 2:            # guarantee >= 2 grid steps (megacore)
        padded_b += tile_b
    return tile_b, padded_b, phys


def encoder_forward_pallas(state, kw):
    B, S, _ = state.shape
    E = EMBED_DIM
    x_bw, x_vec = prepare_inputs(state)
    s_rows = x_bw.shape[1]

    tile_b, padded_b, phys_vmem = _choose_tiling(B, s_rows)
    if padded_b != B:
        pad_b = padded_b - B
        x_bw = jnp.pad(x_bw, ((0, pad_b), (0, 0), (0, 0)))
        x_vec = jnp.pad(x_vec, ((0, pad_b), (0, 0)))

    xbw_bytes = tile_b * s_rows * 128 * (2 * 2 + 4)
    vmem_limit = int(min(max(16 << 20, xbw_bytes + (12 << 20)), phys_vmem - (4 << 20)))

    kernel = functools.partial(_encoder_kernel, seq_len=S)
    row2 = lambda i: (i, 0)
    fix2 = lambda i: (0, 0)
    fix3 = lambda i: (0, 0, 0)

    out = pl.pallas_call(
        kernel,
        out_shape=jax.ShapeDtypeStruct((padded_b, E), jnp.float32),
        grid=(padded_b // tile_b,),
        in_specs=[
            pl.BlockSpec((tile_b, s_rows, KDIM_PAD), lambda i: (i, 0, 0)),   # x_bw (bf16)
            pl.BlockSpec((tile_b, VEC_W), row2),                             # fov|dist|small
            pl.BlockSpec(kw["w_misc"].shape, fix2),                          # w_bw + w_small slab
            pl.BlockSpec(kw["w_fd1"].shape, fix3),                           # fov/dist Toeplitz 1
            pl.BlockSpec(kw["w_fd2"].shape, fix3),                           # fov/dist Toeplitz 2
            pl.BlockSpec(kw["w_out"].shape, fix2),                           # pool-folded out Linear
            pl.BlockSpec(kw["bias"].shape, fix2),                            # bias / LN slab
        ],
        out_specs=pl.BlockSpec((tile_b, E), row2),
        compiler_params=pltpu.CompilerParams(
            dimension_semantics=("parallel",),
            vmem_limit_bytes=vmem_limit,
        ),
    )(x_bw, x_vec, kw["w_misc"], kw["w_fd1"], kw["w_fd2"], kw["w_out"], kw["bias"])
    return out[:B]


# --------------------------------------------------------------------------------
# Pure-JAX reference (f32, HIGHEST precision) for the correctness check
# --------------------------------------------------------------------------------
def encoder_forward_ref(state, p):
    bw, fov, buf, gof, frame, dist = _slice_state(state.astype(jnp.float32))
    hp = jax.lax.Precision.HIGHEST
    dn = ("NCH", "OIH", "NCH")

    def leaky(x):
        return jnp.where(x >= 0, x, NEG_SLOPE * x)

    def conv(x, w, b, stride, pad):
        y = jax.lax.conv_general_dilated(
            x, w, (stride,), [(pad, pad)], dimension_numbers=dn, precision=hp)
        return y + b[None, :, None]

    def lin(x, w, b):
        return jnp.dot(x, w.T, precision=hp) + b

    e_bw = leaky(conv(bw, p["bw_w"], p["bw_b"], 1, 1)).mean(-1)
    h = leaky(conv(fov, p["fov_w1"], p["fov_b1"], 2, 1))
    e_fov = leaky(conv(h, p["fov_w2"], p["fov_b2"], 2, 1)).mean(-1)
    h = leaky(conv(dist, p["dist_w1"], p["dist_b1"], 2, 1))
    e_dist = leaky(conv(h, p["dist_w2"], p["dist_b2"], 2, 1)).mean(-1)
    e_buf = leaky(lin(buf, p["buf_w"], p["buf_b"]))
    e_gof = leaky(lin(gof, p["gof_w"], p["gof_b"]))
    e_fr = leaky(lin(frame, p["fr_w"], p["fr_b"]))
    z = jnp.concatenate([e_bw, e_fov, e_buf, e_gof, e_fr, e_dist], axis=1)
    z = lin(z, p["out_w"], p["out_b"])
    mu = z.mean(-1, keepdims=True)
    var = ((z - mu) ** 2).mean(-1, keepdims=True)
    return (z - mu) / jnp.sqrt(var + LN_EPS) * p["ln_g"] + p["ln_b"]


if __name__ == "__main__":
    key = jax.random.PRNGKey(0)
    k_state, k_params = jax.random.split(key)

    B, S = 2, 10     # S=10 also exercises the in-kernel seq-padding correction
    T, Q = TILE_IN_F, QUALITY_LEVELS
    # feature_dim exactly covering: bw(3) + fov(50T) + buf(1+T) + gof(TQ) + frame(1) + dist(50T)
    F = 3 + FOV_LEN * T + 1 + T + T * Q + 1 + FOV_LEN * T
    state = jax.random.normal(k_state, (B, S, F), dtype=jnp.float32)

    params = init_params(k_params)
    kw = build_kernel_weights(params)          # host-side, once per parameter set

    fwd = jax.jit(encoder_forward_pallas)
    out = jax.block_until_ready(fwd(state, kw))
    ref = jax.block_until_ready(encoder_forward_ref(state, params))

    assert out.shape == (B, EMBED_DIM)
    # tolerance accounts for bf16 MXU inputs/weights vs the f32 HIGHEST reference
    np.testing.assert_allclose(np.asarray(out), np.asarray(ref), rtol=4e-2, atol=4e-2)
    print("KERNEL_OK")
</pallas_src>

<mosaic_0001>
module attributes {stable_mosaic.version = 11 : i64} {
  func.func @_encoder_kernel(%arg0: i32, %arg1: memref<8x16x40xbf16, #tpu.memory_space<vmem>>, %arg2: memref<8x534xbf16, #tpu.memory_space<vmem>>, %arg3: memref<80x128xbf16, #tpu.memory_space<vmem>>, %arg4: memref<2x200x400xbf16, #tpu.memory_space<vmem>>, %arg5: memref<2x400x384xbf16, #tpu.memory_space<vmem>>, %arg6: memref<992x32xbf16, #tpu.memory_space<vmem>>, %arg7: memref<9x512xf32, #tpu.memory_space<vmem>>, %arg8: memref<8x32xf32, #tpu.memory_space<vmem>>) attributes {dimension_semantics = [#tpu.dimension_semantics<parallel>], iteration_bounds = array<i64: 2>, scalar_prefetch = 0 : i64, scratch_operands = 0 : i64, tpu.core_type = #tpu.core_type<tc>, window_params = [{transform_indices = @transform_0, window_bounds = array<i64: 8, 16, 40>}, {transform_indices = @transform_1, window_bounds = array<i64: 8, 534>}, {pipeline_mode = #tpu.pipeline_mode<synchronous>, transform_indices = @transform_2, window_bounds = array<i64: 80, 128>}, {pipeline_mode = #tpu.pipeline_mode<synchronous>, transform_indices = @transform_3, window_bounds = array<i64: 2, 200, 400>}, {pipeline_mode = #tpu.pipeline_mode<synchronous>, transform_indices = @transform_4, window_bounds = array<i64: 2, 400, 384>}, {pipeline_mode = #tpu.pipeline_mode<synchronous>, transform_indices = @transform_5, window_bounds = array<i64: 992, 32>}, {pipeline_mode = #tpu.pipeline_mode<synchronous>, transform_indices = @transform_6, window_bounds = array<i64: 9, 512>}, {transform_indices = @transform_7, window_bounds = array<i64: 8, 32>}]} {
    %c0 = arith.constant 0 : index
    %c0_0 = arith.constant 0 : index
    %0 = vector.load %arg7[%c0, %c0_0] : memref<9x512xf32, #tpu.memory_space<vmem>>, vector<1x128xf32>
    %c1 = arith.constant 1 : index
    %c0_1 = arith.constant 0 : index
    %1 = vector.load %arg7[%c1, %c0_1] : memref<9x512xf32, #tpu.memory_space<vmem>>, vector<1x400xf32>
    %c2 = arith.constant 2 : index
    %c0_2 = arith.constant 0 : index
    %2 = vector.load %arg7[%c2, %c0_2] : memref<9x512xf32, #tpu.memory_space<vmem>>, vector<1x384xf32>
    %c3 = arith.constant 3 : index
    %c0_3 = arith.constant 0 : index
    %3 = vector.load %arg7[%c3, %c0_3] : memref<9x512xf32, #tpu.memory_space<vmem>>, vector<1x400xf32>
    %c4 = arith.constant 4 : index
    %c0_4 = arith.constant 0 : index
    %4 = vector.load %arg7[%c4, %c0_4] : memref<9x512xf32, #tpu.memory_space<vmem>>, vector<1x384xf32>
    %c5 = arith.constant 5 : index
    %c0_5 = arith.constant 0 : index
    %5 = vector.load %arg7[%c5, %c0_5] : memref<9x512xf32, #tpu.memory_space<vmem>>, vector<1x96xf32>
    %c6 = arith.constant 6 : index
    %c0_6 = arith.constant 0 : index
    %6 = vector.load %arg7[%c6, %c0_6] : memref<9x512xf32, #tpu.memory_space<vmem>>, vector<1x32xf32>
    %c7 = arith.constant 7 : index
    %c0_7 = arith.constant 0 : index
    %7 = vector.load %arg7[%c7, %c0_7] : memref<9x512xf32, #tpu.memory_space<vmem>>, vector<1x32xf32>
    %c8 = arith.constant 8 : index
    %c0_8 = arith.constant 0 : index
    %8 = vector.load %arg7[%c8, %c0_8] : memref<9x512xf32, #tpu.memory_space<vmem>>, vector<1x32xf32>
    %c0_9 = arith.constant 0 : index
    %c0_10 = arith.constant 0 : index
    %9 = vector.load %arg3[%c0_9, %c0_10] : memref<80x128xbf16, #tpu.memory_space<vmem>>, vector<40x128xbf16>
    %c48 = arith.constant 48 : index
    %c0_11 = arith.constant 0 : index
    %10 = vector.load %arg3[%c48, %c0_11] : memref<80x128xbf16, #tpu.memory_space<vmem>>, vector<22x96xbf16>
    %c0_12 = arith.constant 0 : index
    %c0_13 = arith.constant 0 : index
    %11 = vector.load %arg6[%c0_12, %c0_13] : memref<992x32xbf16, #tpu.memory_space<vmem>>, vector<128x32xbf16>
    %c128 = arith.constant 128 : index
    %c0_14 = arith.constant 0 : index
    %12 = vector.load %arg6[%c128, %c0_14] : memref<992x32xbf16, #tpu.memory_space<vmem>>, vector<384x32xbf16>
    %c512 = arith.constant 512 : index
    %c0_15 = arith.constant 0 : index
    %13 = vector.load %arg6[%c512, %c0_15] : memref<992x32xbf16, #tpu.memory_space<vmem>>, vector<96x32xbf16>
    %c608 = arith.constant 608 : index
    %c0_16 = arith.constant 0 : index
    %14 = vector.load %arg6[%c608, %c0_16] : memref<992x32xbf16, #tpu.memory_space<vmem>>, vector<384x32xbf16>
    %c0_17 = arith.constant 0 : index
    %c0_18 = arith.constant 0 : index
    %c0_19 = arith.constant 0 : index
    %15 = vector.load %arg1[%c0_17, %c0_18, %c0_19] : memref<8x16x40xbf16, #tpu.memory_space<vmem>>, vector<8x16x40xbf16>
    %16 = vector.shape_cast %15 : vector<8x16x40xbf16> to vector<128x40xbf16>
    %cst = arith.constant dense<0.000000e+00> : vector<128x128xf32>
    %17 = tpu.matmul %16, %9, %cst {dimension_numbers = #tpu.dot_dimension_numbers<[1], [0], [0], [1], [0, 0, 1, 1], [], []>} : vector<128x40xbf16>, vector<40x128xbf16>, vector<128x128xf32> -> vector<128x128xf32>
    %18 = vector.shape_cast %17 : vector<128x128xf32> to vector<8x16x128xf32>
    %19 = vector.shape_cast %0 : vector<1x128xf32> to vector<1x1x128xf32>
    %20 = vector.broadcast %19 : vector<1x1x128xf32> to vector<8x16x128xf32>
    %21 = arith.addf %18, %20 : vector<8x16x128xf32>
    %cst_20 = arith.constant 0.000000e+00 : f32
    %22 = vector.broadcast %cst_20 : f32 to vector<8x16x128xf32>
    %23 = arith.cmpf oge, %21, %22 : vector<8x16x128xf32>
    %cst_21 = arith.constant 0.00999999977 : f32
    %24 = vector.broadcast %cst_21 : f32 to vector<8x16x128xf32>
    %25 = arith.mulf %24, %21 : vector<8x16x128xf32>
    %26 = arith.select %23, %21, %25 : vector<8x16x128xi1>, vector<8x16x128xf32>
    %cst_22 = arith.constant dense<0.000000e+00> : vector<8x128xf32>
    %27 = vector.multi_reduction <add>, %26, %cst_22 [1] : vector<8x16x128xf32> to vector<8x128xf32>
    %cst_23 = arith.constant 1.000000e-01 : f32
    %28 = vector.broadcast %cst_23 : f32 to vector<8x128xf32>
    %29 = arith.mulf %27, %28 : vector<8x128xf32>
    %30 = arith.truncf %29 : vector<8x128xf32> to vector<8x128xbf16>
    %cst_24 = arith.constant dense<0.000000e+00> : vector<8x32xf32>
    %31 = tpu.matmul %30, %11, %cst_24 {dimension_numbers = #tpu.dot_dimension_numbers<[1], [0], [0], [1], [0, 0, 1, 1], [], []>} : vector<8x128xbf16>, vector<128x32xbf16>, vector<8x32xf32> -> vector<8x32xf32>
    %c0_25 = arith.constant 0 : index
    %c0_26 = arith.constant 0 : index
    %32 = vector.load %arg7[%c0_25, %c0_26] : memref<9x512xf32, #tpu.memory_space<vmem>>, vector<1x32xf32>
    %cst_27 = arith.constant 0.000000e+00 : f32
    %33 = vector.broadcast %cst_27 : f32 to vector<1x32xf32>
    %34 = arith.cmpf oge, %32, %33 : vector<1x32xf32>
    %cst_28 = arith.constant 0.00999999977 : f32
    %35 = vector.broadcast %cst_28 : f32 to vector<1x32xf32>
    %36 = arith.mulf %35, %32 : vector<1x32xf32>
    %37 = arith.select %34, %32, %36 : vector<1x32xi1>, vector<1x32xf32>
    %38 = arith.truncf %37 : vector<1x32xf32> to vector<1x32xbf16>
    %c0_29 = arith.constant 0 : index
    %c0_30 = arith.constant 0 : index
    %39 = vector.load %arg6[%c0_29, %c0_30] : memref<992x32xbf16, #tpu.memory_space<vmem>>, vector<32x32xbf16>
    %cst_31 = arith.constant dense<0.000000e+00> : vector<1x32xf32>
    %40 = tpu.matmul %38, %39, %cst_31 {dimension_numbers = #tpu.dot_dimension_numbers<[1], [0], [0], [1], [0, 0, 1, 1], [], []>} : vector<1x32xbf16>, vector<32x32xbf16>, vector<1x32xf32> -> vector<1x32xf32>
    %cst_32 = arith.constant 5.400000e+00 : f32
    %41 = vector.broadcast %cst_32 : f32 to vector<1x32xf32>
    %42 = arith.mulf %41, %40 : vector<1x32xf32>
    %43 = vector.broadcast %42 : vector<1x32xf32> to vector<8x32xf32>
    %44 = arith.subf %31, %43 : vector<8x32xf32>
    %c0_33 = arith.constant 0 : index
    %c0_34 = arith.constant 0 : index
    %45 = vector.load %arg2[%c0_33, %c0_34] : memref<8x534xbf16, #tpu.memory_space<vmem>>, vector<8x200xbf16>
    %c0_35 = arith.constant 0 : index
    %c0_36 = arith.constant 0 : index
    %c0_37 = arith.constant 0 : index
    %46 = vector.load %arg4[%c0_35, %c0_36, %c0_37] : memref<2x200x400xbf16, #tpu.memory_space<vmem>>, vector<1x200x400xbf16>
    %47 = vector.shape_cast %46 : vector<1x200x400xbf16> to vector<200x400xbf16>
    %cst_38 = arith.constant dense<0.000000e+00> : vector<8x400xf32>
    %48 = tpu.matmul %45, %47, %cst_38 {dimension_numbers = #tpu.dot_dimension_numbers<[1], [0], [0], [1], [0, 0, 1, 1], [], []>} : vector<8x200xbf16>, vector<200x400xbf16>, vector<8x400xf32> -> vector<8x400xf32>
    %49 = vector.broadcast %1 : vector<1x400xf32> to vector<8x400xf32>
    %50 = arith.addf %48, %49 : vector<8x400xf32>
    %cst_39 = arith.constant 0.000000e+00 : f32
    %51 = vector.broadcast %cst_39 : f32 to vector<8x400xf32>
    %52 = arith.cmpf oge, %50, %51 : vector<8x400xf32>
    %cst_40 = arith.constant 0.00999999977 : f32
    %53 = vector.broadcast %cst_40 : f32 to vector<8x400xf32>
    %54 = arith.mulf %53, %50 : vector<8x400xf32>
    %55 = arith.select %52, %50, %54 : vector<8x400xi1>, vector<8x400xf32>
    %56 = arith.truncf %55 : vector<8x400xf32> to vector<8x400xbf16>
    %c0_41 = arith.constant 0 : index
    %c0_42 = arith.constant 0 : index
    %c0_43 = arith.constant 0 : index
    %57 = vector.load %arg5[%c0_41, %c0_42, %c0_43] : memref<2x400x384xbf16, #tpu.memory_space<vmem>>, vector<1x400x384xbf16>
    %58 = vector.shape_cast %57 : vector<1x400x384xbf16> to vector<400x384xbf16>
    %cst_44 = arith.constant dense<0.000000e+00> : vector<8x384xf32>
    %59 = tpu.matmul %56, %58, %cst_44 {dimension_numbers = #tpu.dot_dimension_numbers<[1], [0], [0], [1], [0, 0, 1, 1], [], []>} : vector<8x400xbf16>, vector<400x384xbf16>, vector<8x384xf32> -> vector<8x384xf32>
    %60 = vector.broadcast %2 : vector<1x384xf32> to vector<8x384xf32>
    %61 = arith.addf %59, %60 : vector<8x384xf32>
    %cst_45 = arith.constant 0.000000e+00 : f32
    %62 = vector.broadcast %cst_45 : f32 to vector<8x384xf32>
    %63 = arith.cmpf oge, %61, %62 : vector<8x384xf32>
    %cst_46 = arith.constant 0.00999999977 : f32
    %64 = vector.broadcast %cst_46 : f32 to vector<8x384xf32>
    %65 = arith.mulf %64, %61 : vector<8x384xf32>
    %66 = arith.select %63, %61, %65 : vector<8x384xi1>, vector<8x384xf32>
    %c0_47 = arith.constant 0 : index
    %c256 = arith.constant 256 : index
    %67 = vector.load %arg2[%c0_47, %c256] : memref<8x534xbf16, #tpu.memory_space<vmem>>, vector<8x200xbf16>
    %c1_48 = arith.constant 1 : index
    %c0_49 = arith.constant 0 : index
    %c0_50 = arith.constant 0 : index
    %68 = vector.load %arg4[%c1_48, %c0_49, %c0_50] : memref<2x200x400xbf16, #tpu.memory_space<vmem>>, vector<1x200x400xbf16>
    %69 = vector.shape_cast %68 : vector<1x200x400xbf16> to vector<200x400xbf16>
    %cst_51 = arith.constant dense<0.000000e+00> : vector<8x400xf32>
    %70 = tpu.matmul %67, %69, %cst_51 {dimension_numbers = #tpu.dot_dimension_numbers<[1], [0], [0], [1], [0, 0, 1, 1], [], []>} : vector<8x200xbf16>, vector<200x400xbf16>, vector<8x400xf32> -> vector<8x400xf32>
    %71 = vector.broadcast %3 : vector<1x400xf32> to vector<8x400xf32>
    %72 = arith.addf %70, %71 : vector<8x400xf32>
    %cst_52 = arith.constant 0.000000e+00 : f32
    %73 = vector.broadcast %cst_52 : f32 to vector<8x400xf32>
    %74 = arith.cmpf oge, %72, %73 : vector<8x400xf32>
    %cst_53 = arith.constant 0.00999999977 : f32
    %75 = vector.broadcast %cst_53 : f32 to vector<8x400xf32>
    %76 = arith.mulf %75, %72 : vector<8x400xf32>
    %77 = arith.select %74, %72, %76 : vector<8x400xi1>, vector<8x400xf32>
    %78 = arith.truncf %77 : vector<8x400xf32> to vector<8x400xbf16>
    %c1_54 = arith.constant 1 : index
    %c0_55 = arith.constant 0 : index
    %c0_56 = arith.constant 0 : index
    %79 = vector.load %arg5[%c1_54, %c0_55, %c0_56] : memref<2x400x384xbf16, #tpu.memory_space<vmem>>, vector<1x400x384xbf16>
    %80 = vector.shape_cast %79 : vector<1x400x384xbf16> to vector<400x384xbf16>
    %cst_57 = arith.constant dense<0.000000e+00> : vector<8x384xf32>
    %81 = tpu.matmul %78, %80, %cst_57 {dimension_numbers = #tpu.dot_dimension_numbers<[1], [0], [0], [1], [0, 0, 1, 1], [], []>} : vector<8x400xbf16>, vector<400x384xbf16>, vector<8x384xf32> -> vector<8x384xf32>
    %82 = vector.broadcast %4 : vector<1x384xf32> to vector<8x384xf32>
    %83 = arith.addf %81, %82 : vector<8x384xf32>
    %cst_58 = arith.constant 0.000000e+00 : f32
    %84 = vector.broadcast %cst_58 : f32 to vector<8x384xf32>
    %85 = arith.cmpf oge, %83, %84 : vector<8x384xf32>
    %cst_59 = arith.constant 0.00999999977 : f32
    %86 = vector.broadcast %cst_59 : f32 to vector<8x384xf32>
    %87 = arith.mulf %86, %83 : vector<8x384xf32>
    %88 = arith.select %85, %83, %87 : vector<8x384xi1>, vector<8x384xf32>
    %89 = arith.truncf %66 : vector<8x384xf32> to vector<8x384xbf16>
    %cst_60 = arith.constant dense<0.000000e+00> : vector<8x32xf32>
    %90 = tpu.matmul %89, %12, %cst_60 {dimension_numbers = #tpu.dot_dimension_numbers<[1], [0], [0], [1], [0, 0, 1, 1], [], []>} : vector<8x384xbf16>, vector<384x32xbf16>, vector<8x32xf32> -> vector<8x32xf32>
    %91 = arith.addf %44, %90 : vector<8x32xf32>
    %92 = arith.truncf %88 : vector<8x384xf32> to vector<8x384xbf16>
    %cst_61 = arith.constant dense<0.000000e+00> : vector<8x32xf32>
    %93 = tpu.matmul %92, %14, %cst_61 {dimension_numbers = #tpu.dot_dimension_numbers<[1], [0], [0], [1], [0, 0, 1, 1], [], []>} : vector<8x384xbf16>, vector<384x32xbf16>, vector<8x32xf32> -> vector<8x32xf32>
    %94 = arith.addf %91, %93 : vector<8x32xf32>
    %c0_62 = arith.constant 0 : index
    %c512_63 = arith.constant 512 : index
    %95 = vector.load %arg2[%c0_62, %c512_63] : memref<8x534xbf16, #tpu.memory_space<vmem>>, vector<8x22xbf16>
    %cst_64 = arith.constant dense<0.000000e+00> : vector<8x96xf32>
    %96 = tpu.matmul %95, %10, %cst_64 {dimension_numbers = #tpu.dot_dimension_numbers<[1], [0], [0], [1], [0, 0, 1, 1], [], []>} : vector<8x22xbf16>, vector<22x96xbf16>, vector<8x96xf32> -> vector<8x96xf32>
    %97 = vector.broadcast %5 : vector<1x96xf32> to vector<8x96xf32>
    %98 = arith.addf %96, %97 : vector<8x96xf32>
    %cst_65 = arith.constant 0.000000e+00 : f32
    %99 = vector.broadcast %cst_65 : f32 to vector<8x96xf32>
    %100 = arith.cmpf oge, %98, %99 : vector<8x96xf32>
    %cst_66 = arith.constant 0.00999999977 : f32
    %101 = vector.broadcast %cst_66 : f32 to vector<8x96xf32>
    %102 = arith.mulf %101, %98 : vector<8x96xf32>
    %103 = arith.select %100, %98, %102 : vector<8x96xi1>, vector<8x96xf32>
    %104 = arith.truncf %103 : vector<8x96xf32> to vector<8x96xbf16>
    %cst_67 = arith.constant dense<0.000000e+00> : vector<8x32xf32>
    %105 = tpu.matmul %104, %13, %cst_67 {dimension_numbers = #tpu.dot_dimension_numbers<[1], [0], [0], [1], [0, 0, 1, 1], [], []>} : vector<8x96xbf16>, vector<96x32xbf16>, vector<8x32xf32> -> vector<8x32xf32>
    %106 = arith.addf %94, %105 : vector<8x32xf32>
    %107 = vector.broadcast %6 : vector<1x32xf32> to vector<8x32xf32>
    %108 = arith.addf %106, %107 : vector<8x32xf32>
    %cst_68 = arith.constant dense<0.000000e+00> : vector<8xf32>
    %109 = vector.multi_reduction <add>, %108, %cst_68 [1] : vector<8x32xf32> to vector<8xf32>
    %110 = vector.shape_cast %109 : vector<8xf32> to vector<8x1xf32>
    %cst_69 = arith.constant 3.200000e+01 : f32
    %111 = vector.broadcast %cst_69 : f32 to vector<8x1xf32>
    %112 = arith.divf %110, %111 : vector<8x1xf32>
    %113 = vector.broadcast %112 : vector<8x1xf32> to vector<8x32xf32>
    %114 = arith.subf %108, %113 : vector<8x32xf32>
    %115 = arith.mulf %114, %114 : vector<8x32xf32>
    %cst_70 = arith.constant dense<0.000000e+00> : vector<8xf32>
    %116 = vector.multi_reduction <add>, %115, %cst_70 [1] : vector<8x32xf32> to vector<8xf32>
    %117 = vector.shape_cast %116 : vector<8xf32> to vector<8x1xf32>
    %cst_71 = arith.constant 3.200000e+01 : f32
    %118 = vector.broadcast %cst_71 : f32 to vector<8x1xf32>
    %119 = arith.divf %117, %118 : vector<8x1xf32>
    %120 = vector.broadcast %112 : vector<8x1xf32> to vector<8x32xf32>
    %121 = arith.subf %108, %120 : vector<8x32xf32>
    %cst_72 = arith.constant 9.99999974E-6 : f32
    %122 = vector.broadcast %cst_72 : f32 to vector<8x1xf32>
    %123 = arith.addf %119, %122 : vector<8x1xf32>
    %124 = math.rsqrt %123 : vector<8x1xf32>
    %125 = vector.broadcast %124 : vector<8x1xf32> to vector<8x32xf32>
    %126 = arith.mulf %121, %125 : vector<8x32xf32>
    %127 = vector.broadcast %7 : vector<1x32xf32> to vector<8x32xf32>
    %128 = arith.mulf %126, %127 : vector<8x32xf32>
    %129 = vector.broadcast %8 : vector<1x32xf32> to vector<8x32xf32>
    %130 = arith.addf %128, %129 : vector<8x32xf32>
    %c0_73 = arith.constant 0 : index
    %c0_74 = arith.constant 0 : index
    %131 = vector.load %arg8[%c0_73, %c0_74] : memref<8x32xf32, #tpu.memory_space<vmem>>, vector<8x32xf32>
    tpu.vector_store %arg8[%c0_73, %c0_74], %130 {strides = array<i32>} : memref<8x32xf32, #tpu.memory_space<vmem>>, vector<8x32xf32>,
    return
  }
  func.func @transform_0(%arg0: i32) -> (i32, i32, i32) {
    %c0_i32 = arith.constant 0 : i32
    %c0_i32_0 = arith.constant 0 : i32
    %c0_i32_1 = arith.constant 0 : i32
    return %arg0, %c0_i32, %c0_i32_0 : i32, i32, i32
  }
  func.func @transform_1(%arg0: i32) -> (i32, i32) {
    %c0_i32 = arith.constant 0 : i32
    %c0_i32_0 = arith.constant 0 : i32
    return %arg0, %c0_i32 : i32, i32
  }
  func.func @transform_2(%arg0: i32) -> (i32, i32) {
    %c0_i32 = arith.constant 0 : i32
    %c0_i32_0 = arith.constant 0 : i32
    %c0_i32_1 = arith.constant 0 : i32
    return %c0_i32, %c0_i32_0 : i32, i32
  }
  func.func @transform_3(%arg0: i32) -> (i32, i32, i32) {
    %c0_i32 = arith.constant 0 : i32
    %c0_i32_0 = arith.constant 0 : i32
    %c0_i32_1 = arith.constant 0 : i32
    %c0_i32_2 = arith.constant 0 : i32
    return %c0_i32, %c0_i32_0, %c0_i32_1 : i32, i32, i32
  }
  func.func @transform_4(%arg0: i32) -> (i32, i32, i32) {
    %c0_i32 = arith.constant 0 : i32
    %c0_i32_0 = arith.constant 0 : i32
    %c0_i32_1 = arith.constant 0 : i32
    %c0_i32_2 = arith.constant 0 : i32
    return %c0_i32, %c0_i32_0, %c0_i32_1 : i32, i32, i32
  }
  func.func @transform_5(%arg0: i32) -> (i32, i32) {
    %c0_i32 = arith.constant 0 : i32
    %c0_i32_0 = arith.constant 0 : i32
    %c0_i32_1 = arith.constant 0 : i32
    return %c0_i32, %c0_i32_0 : i32, i32
  }
  func.func @transform_6(%arg0: i32) -> (i32, i32) {
    %c0_i32 = arith.constant 0 : i32
    %c0_i32_0 = arith.constant 0 : i32
    %c0_i32_1 = arith.constant 0 : i32
    return %c0_i32, %c0_i32_0 : i32, i32
  }
  func.func @transform_7(%arg0: i32) -> (i32, i32) {
    %c0_i32 = arith.constant 0 : i32
    %c0_i32_0 = arith.constant 0 : i32
    return %arg0, %c0_i32 : i32, i32
  }
}

</mosaic_0001>

<bundles_post_ra>
// kernel: encoder_forward_pallas.1
= control target key start
LH: loop header
LB: loop body
LE: loop exit
PB: predicated region body
PF: predicated region fallthrough
CT: control target
= control target key end

     0   :  { %12 = vsyncpa [#allocation3], 0  ;;  %s5221_s24 = smov 0   ;;  %s6172_s0 = inlined_call_operand.vmem [shape: bf16[16,16,40], index: 0, kind: input, shape index: {}]   ;;  %s6173_s1 = inlined_call_operand.vmem [shape: bf16[16,534], index: 1, kind: input, shape index: {}]   ;;  %s6174_s2 = inlined_call_operand.vmem [shape: bf16[80,128], index: 2, kind: input, shape index: {}]   ;;  %s6175_s3 = inlined_call_operand.hbm [shape: bf16[2,200,400], index: 3, kind: input, shape index: {}]   ;;  %s6176_s4 = inlined_call_operand.vmem [shape: bf16[2,400,384], index: 4, kind: input, shape index: {}]   ;;  %s6177_s5 = inlined_call_operand.vmem [shape: bf16[992,32], index: 5, kind: input, shape index: {}]   ;;  %s6178_s6 = inlined_call_operand.vmem [shape: f32[9,512], index: 6, kind: input, shape index: {}]   ;;  %s6179_s7 = inlined_call_operand.vmem [shape: f32[16,32], index: 7, kind: output, shape index: {}]  }
   0x1 LB: > { %s5227_s25 = sadd.s32 4294967295, %s5173_s24   ;;  %p3948_p0 = scmp.ge.s32.totalorder %s5173_s24, 1  ;;  %s5173_s24 = sphi %s5221_s24, %s18_s24  }
   0x2   : > { %p206_p1 = scmp.lt.s32.totalorder %s5173_s24, 3  ;;  %s5175_s26 = smov [#allocation2]  }
   0x3   : > { %s221_s27 = sshll.u32 %s5175_s26, 4  ;;  %p4686_p3 = scmp.eq.s32.totalorder %s5227_s25, 0  ;;  %s222_s27 = int_to_ptr.vmem [resolvable:$true] %s221_s27 }
   0x4   : > { %p5231_p2 = pnand %p3948_p0, %p206_p1  ;;  %s5148_s29 = scalar_lea.vmem %s222_s27, 12800 }
   0x5   : > { %p5149_p7 = scmp.ne.s32.totalorder %s222_s27, %s5148_s29  ;;  %p5156_p10 = scmp.lt.s32.totalorder %s222_s27, %s222_s27 }
   0x6   : > { %p4682_p4 = pneg %p5231_p2  ;;  %p5157_p11 = scmp.lt.s32.totalorder %s5148_s29, %s5148_s29 }
   0x8   : > { %p4683_p5 = pnand %p4686_p3, %p4682_p4  ;;  %p5158_p12 = por %p5157_p11, %p5156_p10 }
   0xa   : > { %p5139_p6 = pneg %p4683_p5 }
   0xc   : > { %p5151_p8 = pnand %p5149_p7, %p5139_p6 }
   0xe   : > { %p5152_p9 = pneg %p5151_p8 }
  0x10   : > { %p5159_p13 = pnand %p5158_p12, %p5152_p9 }
  0x12   : > { %5162 = shalt.err (!%p5159_p13)
}
  0x13   : > { %s5176_s30 = smov 256   ;;  %s5177_s8 = smov 16  }
  0x14   : > { %4685 = dma.hbm_to_vmem [thread:$0]  (!%p4683_p5), %s6175_s3, 12800, %s222_s27, [#allocation3], %s5176_s30, %s5176_s30, %s5177_s8  }
  0x15   : > { %264 = sbr.rel (%p5231_p2) target bundleno = 1763 (0x6e3), region = 48 }
  0x1a   : > { %5168 = dma.done.wait (%p4686_p3), [#allocation3], 12800  }
  0x1b   : > { %5170 = vsyncadd (%p4686_p3), [#allocation3], 4294954496  ;;  %s3953_s11 = sshll.u32 %s5227_s25, 3  ;;  %vm559_vm0 = vcmask 1043456   ;;  %v4702_v0 = vld [vmem:[%s6174_s2 + $0x10] ss:$0 sps:$4 sm:$0xff]  }
  0x1c   : > { %p302_p0 = scmp.lt.s32.totalorder %s3953_s11, 15  ;;  %v4703_v1 = vld [vmem:[%s6174_s2 + $0x8] sm:$0xff]   ;;  %4676 = vmatprep.subr.msk.bf16.mxu0 %vm559_vm0, %v4702_v0  ;;  %v561_v2 = vsel %vm559_vm0, %v4702_v0, 0  ;;  %vm534_vm1 = vcmask 326656   ;;  %v4704_v4 = vld [vmem:[%s6174_s2] sm:$0xff]   ;;  %v4716_v14 = vld [vmem:[%s6177_s5 + $0x38] sm:$0xff]  }
  0x1d   : > { %4563 = vmatpush3.bf16.msra.mxu0 %v561_v2  ;;  %v4715_v12 = vld [vmem:[#allocation2 + $0xe4] ss:$16 sps:$4 sm:$0xff]   ;;  %v4713_v13 = vld [vmem:[#allocation2 + $0xe0] ss:$16 sps:$4 sm:$0xff]   ;;  %v5178_v15 = vmov 0.0   ;;  %v4724_v21 = vld [vmem:[%s6177_s5 + $0x28] sm:$0xff]  }
  0x1e   : > { %s6182_s11 = smov (!%p302_p0, %s3953_s11), 15  ;;  %4564 = vmatprep.subr.bf16.mxu0 %v4703_v1  ;;  %4584 = vmatprep.subr.bf16.mxu1 %v5178_v15  ;;  %v4719_v16 = vld [vmem:[#allocation2 + $0xc4] ss:$16 sps:$4 sm:$0xff]   ;;  %v4717_v17 = vld [vmem:[#allocation2 + $0xc0] ss:$16 sps:$4 sm:$0xff]   ;;  %v4732_v27 = vld [vmem:[%s6177_s5 + $0x18] sm:$0xff]  }
  0x1f   : > { %s4422_s12 = sshll.u32 %s6182_s11, 3  ;;  %4585 = vmatpush3.bf16.msra.mxu1 %v4716_v14  ;;  %v4720_v18 = vld [vmem:[%s6177_s5 + $0x30] sm:$0xff]   ;;  %v4728_v24 = vld [vmem:[%s6177_s5 + $0x20] sm:$0xff]   ;;  %v4740_v33 = vld [vmem:[%s6177_s5 + $0x8] sm:$0xff]   ;;  %vm5179_vm2 = vmmov 0   ;;  %p308_p1 = scmp.lt.s32.totalorder %s5227_s25, 1 }
  0x20   : > { %s306_s17 = scalar_lea.vmem %s6172_s0, %s4422_s12  ;;  %4586 = vmatprep.subr.bf16.mxu1 %v5178_v15  ;;  %v4723_v19 = vld [vmem:[#allocation2 + $0xa4] ss:$16 sps:$4 sm:$0xff]   ;;  %v4721_v20 = vld [vmem:[#allocation2 + $0xa0] ss:$16 sps:$4 sm:$0xff]   ;;  %4600 = vmatprep.mubr.msk.bf16.mxu1 %vm5179_vm2, %v5178_v15  ;;  %vm1314_vm3 = vcmask 588800  }
  0x21   : > { %v4705_v3 = vld [vmem:[%s306_s17] sm:$0xff]   ;;  %4565 = vmatpush3.bf16.msra.mxu0 %v4703_v1  ;;  %v4706_v5 = vld [vmem:[%s306_s17 + $0x8] sm:$0xff]   ;;  %v4707_v6 = vld [vmem:[%s306_s17 + $0x10] sm:$0xff]   ;;  %s6184_s25 = smov (!%p308_p1, %s5227_s25), 1 }
  0x22   : > { %4568 = vmatprep.mubr.msk.bf16.mxu0 %vm534_vm1, %v4705_v3  ;;  %4566 = vmatprep.subr.bf16.mxu0 %v4704_v4  ;;  %v4708_v7 = vld [vmem:[%s306_s17 + $0x18] sm:$0xff]   ;;  %v4709_v8 = vld [vmem:[%s306_s17 + $0x20] sm:$0xff]   ;;  %v4710_v9 = vld [vmem:[%s306_s17 + $0x28] sm:$0xff]   ;;  %s3957_s11 = sshll.u32 %s6184_s25, 3 }
  0x23   : > { %v4711_v10 = vld [vmem:[%s306_s17 + $0x30] sm:$0xff]   ;;  %v4712_v11 = vld [vmem:[%s306_s17 + $0x38] sm:$0xff]   ;;  %4587 = vmatpush3.bf16.msra.mxu1 %v4720_v18  ;;  %v4744_v36 = vld [vmem:[%s6177_s5] sm:$0xff]   ;;  %s4677_s17 = smul.u32 20, %s6184_s25  ;;  %s316_s16 = scalar_lea.vmem %s6179_s7, %s3957_s11 }
  0x24   : > { %4588 = vmatprep.subr.bf16.mxu1 %v5178_v15  ;;  %v4727_v22 = vld [vmem:[#allocation2 + $0x84] ss:$16 sps:$4 sm:$0xff]   ;;  %v4725_v23 = vld [vmem:[#allocation2 + $0x80] ss:$16 sps:$4 sm:$0xff]   ;;  %v4803_v53 = vld [vmem:[%s6176_s4 + $0xac] ss:$12 sps:$4 sm:$0xff]  }
  0x25   : > { %4567 = vmatpush3.bf16.msra.mxu0 %v4704_v4  ;;  %v4731_v25 = vld [vmem:[#allocation2 + $0x64] ss:$16 sps:$4 sm:$0xff]   ;;  %v4729_v26 = vld [vmem:[#allocation2 + $0x60] ss:$16 sps:$4 sm:$0xff]   ;;  %s5317_s20 = scalar_lea.vmem %s6173_s1, %s4677_s17  ;;  %v4809_v57 = vld [vmem:[%s6176_s4 + $0x7c] ss:$12 sps:$4 sm:$0xff]  }
  0x26   : > { %1330 = vmatprep.subr.bf16.mxu0 %v4715_v12  ;;  %v4735_v28 = vld [vmem:[#allocation2 + $0x44] ss:$16 sps:$4 sm:$0xff]   ;;  %v4733_v29 = vld [vmem:[#allocation2 + $0x40] ss:$16 sps:$4 sm:$0xff]  }
  0x27   : > { %4589 = vmatpush3.bf16.msra.mxu1 %v4724_v21  ;;  %v4736_v30 = vld [vmem:[%s6177_s5 + $0x10] sm:$0xff]   ;;  %v1035_v37 = vld [vmem:[#allocation2 + $0x180] sm:$0xff] }
  0x28   : > { %4569 = vmatmul.mubr.msk.bf16.vlgmr.msra.gmra.mxu0 %vm534_vm1, %v4706_v5  ;;  %4590 = vmatprep.subr.bf16.mxu1 %v5178_v15  ;;  %v4737_v31 = vld [vmem:[#allocation2 + $0x20] ss:$16 sps:$4 sm:$0xff]   ;;  %v4739_v32 = vld [vmem:[#allocation2 + $0x24] ss:$16 sps:$4 sm:$0xff]   ;;  %v4043_v38 = vcombine.high %v1035_v37, %v1035_v37  ;;  %v4042_v39 = vcombine.low %v1035_v37, %v1035_v37  ;;  %v4815_v5 = vld [vmem:[%s6176_s4 + $0x4c] ss:$12 sps:$4 sm:$0xff]  }
  0x29   : > { %4572 = vmatprep.mubr.msk.bf16.mxu0 %vm534_vm1, %v4707_v6  ;;  %1331 = vmatpush1.bf16.msra.mxu0 %v4713_v13  ;;  %v4743_v34 = vld [vmem:[#allocation2 + $0x4] ss:$16 sps:$4 sm:$0xff]   ;;  %v4741_v35 = vld [vmem:[#allocation2] ss:$16 sps:$4 sm:$0xff]  }
  0x2a   : > { %1332 = vmatprep.subr.bf16.mxu0 %v4719_v16  ;;  %v1319_v40 = vsel %vm559_vm0, %v4042_v39, 0  ;;  %v4748_v41 = vld [vmem:[#allocation2 + $0x160] ss:$16 sps:$4 sm:$0xff]   ;;  %v4750_v42 = vld [vmem:[#allocation2 + $0x164] ss:$16 sps:$4 sm:$0xff]  }
  0x2b   : > { %4591 = vmatpush3.bf16.msra.mxu1 %v4728_v24  ;;  %v4752_v43 = vld [vmem:[#allocation2 + $0x140] ss:$16 sps:$4 sm:$0xff]   ;;  %v4754_v44 = vld [vmem:[#allocation2 + $0x144] ss:$16 sps:$4 sm:$0xff]  }
  0x2c   : > { %4592 = vmatprep.subr.bf16.mxu1 %v5178_v15  ;;  %v4758_v45 = vld [vmem:[#allocation2 + $0x120] ss:$16 sps:$4 sm:$0xff]   ;;  %v4760_v46 = vld [vmem:[#allocation2 + $0x124] ss:$16 sps:$4 sm:$0xff]  }
  0x2d   : > { %1333 = vmatpush1.bf16.msra.mxu0 %v4717_v17  ;;  %v4764_v47 = vld [vmem:[#allocation2 + $0x100] ss:$16 sps:$4 sm:$0xff]   ;;  %v4766_v48 = vld [vmem:[#allocation2 + $0x104] ss:$16 sps:$4 sm:$0xff]  }
  0x2e   : > { %1334 = vmatprep.subr.bf16.mxu0 %v4723_v19  ;;  %v986_v49 = vld [vmem:[%s5317_s20] sm:$0xff]  ;;  %v4801_v52 = vld [vmem:[%s6176_s4 + $0xa8] ss:$12 sps:$4 sm:$0xff]   ;;  %v4804_v56 = vld [vmem:[%s6176_s4 + $0x90] ss:$12 sps:$4 sm:$0xff]  }
  0x2f   : > { %4593 = vmatpush3.bf16.msra.mxu1 %v4732_v27  ;;  %v5320_v50 = vcombine.low %v986_v49, %v986_v49  ;;  %v5322_v51 = vcombine.high %v986_v49, %v986_v49  ;;  %v4806_v54 = vld [vmem:[%s6176_s4 + $0x94] ss:$12 sps:$4 sm:$0xff]   ;;  %v4807_v61 = vld [vmem:[%s6176_s4 + $0x78] ss:$12 sps:$4 sm:$0xff]  }
  0x30   : > { %4573 = vmatmul.mubr.msk.bf16.gmra.mxu0 %vm534_vm1, %v4708_v7  ;;  %4594 = vmatprep.subr.bf16.mxu1 %v5178_v15  ;;  %v5339_v55 = vld [vmem:[%s6178_s6] ss:$0 sm:$0xff]  ;;  %v4812_v63 = vld [vmem:[%s6176_s4 + $0x64] ss:$12 sps:$4 sm:$0xff]   ;;  %v4813_v17 = vld [vmem:[%s6176_s4 + $0x48] ss:$12 sps:$4 sm:$0xff]  }
  0x31   : > { %4576 = vmatprep.mubr.msk.bf16.mxu0 %vm534_vm1, %v4709_v8  ;;  %1335 = vmatpush1.bf16.msra.mxu0 %v4721_v20  ;;  %v4810_v4 = vld [vmem:[%s6176_s4 + $0x60] ss:$12 sps:$4 sm:$0xff]  }
  0x32   : > { %1336 = vmatprep.subr.bf16.mxu0 %v4727_v22  ;;  %v4818_v21 = vld [vmem:[%s6176_s4 + $0x34] ss:$12 sps:$4 sm:$0xff]  }
  0x33   : > { %4595 = vmatpush3.bf16.msra.mxu1 %v4736_v30  ;;  %v4821_v30 = vld [vmem:[%s6176_s4 + $0x1c] ss:$12 sps:$4 sm:$0xff]  }
  0x34   : > { %4596 = vmatprep.subr.bf16.mxu1 %v5178_v15 }
  0x35   : > { %1337 = vmatpush1.bf16.msra.mxu0 %v4725_v23 }
  0x36   : > { %1338 = vmatprep.subr.bf16.mxu0 %v4731_v25 }
  0x37   : > { %4597 = vmatpush3.bf16.msra.mxu1 %v4740_v33 }
  0x38   : > { %4577 = vmatmul.mubr.msk.bf16.gmra.mxu0 %vm534_vm1, %v4710_v9  ;;  %4598 = vmatprep.subr.bf16.mxu1 %v5178_v15 }
  0x39   : > { %4580 = vmatprep.mubr.msk.bf16.mxu0 %vm534_vm1, %v4711_v10  ;;  %1339 = vmatpush1.bf16.msra.mxu0 %v4729_v26  ;;  %v4816_v26 = vld [vmem:[%s6176_s4 + $0x30] ss:$12 sps:$4 sm:$0xff]  }
  0x3a   : > { %1340 = vmatprep.subr.bf16.mxu0 %v4735_v28 }
  0x3b   : > { %4599 = vmatpush3.bf16.msra.mxu1 %v4744_v36 }
  0x3c   : > { %4604 = vmatprep.subr.bf16.mxu1 %v5178_v15 }
  0x3d   : > { %1341 = vmatpush1.bf16.msra.mxu0 %v4733_v29 }
  0x3e   : > { %1342 = vmatprep.subr.bf16.mxu0 %v4739_v32 }
  0x40   : > { %4581 = vmatmul.mubr.msk.bf16.gmra.mxu0 %vm534_vm1, %v4712_v11 }
  0x41   : > { %1343 = vmatpush1.bf16.msra.mxu0 %v4737_v31  ;;  %4047 = vmatprep.mubr.msk.bf16.mxu0 %vm1314_vm3, %v5322_v51 }
  0x42   : > { %1344 = vmatprep.subr.bf16.mxu0 %v4743_v34 }
  0x45   : > { %1345 = vmatpush1.bf16.msra.mxu0 %v4741_v35 }
  0x46   : > { %4046 = vmatprep.subr.msk.bf16.mxu0 %vm559_vm0, %v4043_v38 }
  0x49   : > { %1353 = vmatpush2.bf16.msra.mxu0 %v1319_v40 }
  0x4a   : > { %1354 = vmatprep.subr.bf16.mxu0 %v4750_v42 }
  0x4d   : > { %1355 = vmatpush2.bf16.msra.mxu0 %v4748_v41 }
  0x4e   : > { %1356 = vmatprep.subr.bf16.mxu0 %v4754_v44 }
  0x51   : > { %1357 = vmatpush2.bf16.msra.mxu0 %v4752_v43  ;;  %v4819_v43 = vld [vmem:[%s6176_s4 + $0x18] ss:$12 sps:$4 sm:$0xff]  }
  0x52   : > { %1358 = vmatprep.subr.bf16.mxu0 %v4760_v46  ;;  %v4824_v46 = vld [vmem:[%s6176_s4 + $0x4] ss:$12 sps:$4 sm:$0xff]  }
  0x55   : > { %1359 = vmatpush2.bf16.msra.mxu0 %v4758_v45 }
  0x56   : > { %1360 = vmatprep.subr.bf16.mxu0 %v4766_v48 }
  0x59   : > { %1361 = vmatpush2.bf16.msra.mxu0 %v4764_v47 }
  0x5a   : > { %1948 = vmatprep.subr.bf16.mxu0 %v4803_v53 }
  0x5c   : > { %1363 = vmatmul.mubr.bf16.vlgmr.msra.gmra.mxu0 %v5320_v50 }
  0x5d   : > { %1949 = vmatpush1.bf16.msra.mxu0 %v4801_v52 }
  0x5e   : > { %1950 = vmatprep.subr.bf16.mxu0 %v4806_v54 }
  0x61   : > { %1951 = vmatpush1.bf16.msra.mxu0 %v4804_v56 }
  0x62   : > { %1952 = vmatprep.subr.bf16.mxu0 %v4809_v57 }
  0x65   : > { %1953 = vmatpush1.bf16.msra.mxu0 %v4807_v61 }
  0x66   : > { %1954 = vmatprep.subr.bf16.mxu0 %v4812_v63  ;;  %v4827_v63 = vld [vmem:[%s6176_s4 + $0x16c] ss:$12 sps:$4 sm:$0xff]  }
  0x69   : > { %1955 = vmatpush1.bf16.msra.mxu0 %v4810_v4 }
  0x6a   : > { %1956 = vmatprep.subr.bf16.mxu0 %v4815_v5 }
  0x6d   : > { %1957 = vmatpush1.bf16.msra.mxu0 %v4813_v17 }
  0x6e   : > { %1958 = vmatprep.subr.bf16.mxu0 %v4818_v21 }
  0x71   : > { %1959 = vmatpush1.bf16.msra.mxu0 %v4816_v26 }
  0x72   : > { %1960 = vmatprep.subr.bf16.mxu0 %v4821_v30 }
  0x75   : > { %1961 = vmatpush1.bf16.msra.mxu0 %v4819_v43 }
  0x76   : > { %1962 = vmatprep.subr.bf16.mxu0 %v4824_v46 }
  0xe8   : > { %v4570_v58 = vpop.f32.mrf.mxu0 }
  0xe9   : > { %v662_v59 = vadd.f32 %v4570_v58, %v5339_v55 }
  0xea   : > { %v597_v60 = vpop.f32.mrf.mxu0 }
  0xeb   : > { %v660_v62 = vadd.f32 %v597_v60, %v5339_v55  ;;  %v694_v0 = vmul.f32 0.01, %v662_v59  ;;  %vm678_vm4 = vcmp.ge.f32.partialorder %v662_v59, 0.0  ;;  %v4822_v60 = vld [vmem:[%s6176_s4] ss:$12 sps:$4 sm:$0xff]  }
  0xec   : > { %v4571_v1 = vpop.f32.mrf.mxu0  ;;  %1963 = vmatpush1.bf16.msra.mxu0 %v4822_v60 }
  0xed   : > { %v663_v2 = vadd.f32 %v4571_v1, %v5339_v55  ;;  %v692_v6 = vmul.f32 0.01, %v660_v62  ;;  %v710_v9 = vsel %vm678_vm4, %v662_v59, %v694_v0  ;;  %vm676_vm6 = vcmp.ge.f32.partialorder %v660_v62, 0.0  ;;  %1964 = vmatprep.subr.bf16.mxu0 %v4827_v63 }
  0xee   : > { %v600_v3 = vpop.f32.mrf.mxu0 }
  0xef   : > { %vm679_vm5 = vcmp.ge.f32.partialorder %v663_v2, 0.0  ;;  %v695_v7 = vmul.f32 0.01, %v663_v2  ;;  %v661_v8 = vadd.f32 %v600_v3, %v5339_v55  ;;  %v708_v18 = vsel %vm676_vm6, %v660_v62, %v692_v6 }
  0xf0   : > { %v4574_v10 = vpop.f32.mrf.mxu0 }
  0xf1   : > { %v711_v11 = vsel %vm679_vm5, %v663_v2, %v695_v7  ;;  %vm677_vm7 = vcmp.ge.f32.partialorder %v661_v8, 0.0  ;;  %v693_v12 = vmul.f32 0.01, %v661_v8  ;;  %v666_v13 = vadd.f32 %v4574_v10, %v5339_v55 }
  0xf2   : > { %v731_v14 = vadd.f32 %v711_v11, %v710_v9  ;;  %v613_v16 = vpop.f32.mrf.mxu0  ;;  %v4825_v11 = vld [vmem:[%s6176_s4 + $0x168] ss:$12 sps:$4 sm:$0xff]  }
  0xf3   : > { %v709_v19 = vsel %vm677_vm7, %v661_v8, %v693_v12  ;;  %v664_v20 = vadd.f32 %v613_v16, %v5339_v55  ;;  %v698_v24 = vmul.f32 0.01, %v666_v13  ;;  %vm682_vm8 = vcmp.ge.f32.partialorder %v666_v13, 0.0  ;;  %1965 = vmatpush2.bf16.msra.mxu0 %v4825_v11 }
  0xf4   : > { %v724_v22 = vadd.f32 %v709_v19, %v708_v18  ;;  %v4575_v23 = vpop.f32.mrf.mxu0  ;;  %v732_v27 = vrot.slane %v731_v14, 4  ;;  %vm812_vm7 = vcmask 1041409  }
  0xf5   : > { %v667_v25 = vadd.f32 %v4575_v23, %v5339_v55  ;;  %v696_v31 = vmul.f32 0.01, %v664_v20  ;;  %vm680_vm10 = vcmp.ge.f32.partialorder %v664_v20, 0.0  ;;  %v714_v36 = vsel %vm682_vm8, %v666_v13, %v698_v24 }
  0xf6   : > { %v725_v28 = vrot.slane %v724_v22, 4  ;;  %v616_v29 = vpop.f32.mrf.mxu0  ;;  %v733_v39 = vadd.f32 %v732_v27, %v731_v14  ;;  %vm814_vm8 = vcmask 1042434  }
  0xf7   : > { %vm683_vm9 = vcmp.ge.f32.partialorder %v667_v25, 0.0  ;;  %v699_v32 = vmul.f32 0.01, %v667_v25  ;;  %v665_v33 = vadd.f32 %v616_v29, %v5339_v55  ;;  %v712_v44 = vsel %vm680_vm10, %v664_v20, %v696_v31 }
  0xf8   : > { %v726_v34 = vadd.f32 %v725_v28, %v724_v22  ;;  %v4578_v35 = vpop.f32.mrf.mxu0  ;;  %v734_v56 = vrot.slane %v733_v39, 2  ;;  %vm818_vm10 = vcmask 1044484  }
  0xf9   : > { %v715_v37 = vsel %vm683_vm9, %v667_v25, %v699_v32  ;;  %vm681_vm11 = vcmp.ge.f32.partialorder %v665_v33, 0.0  ;;  %v697_v38 = vmul.f32 0.01, %v665_v33  ;;  %v670_v41 = vadd.f32 %v4578_v35, %v5339_v55 }
  0xfa   : > { %v745_v40 = vadd.f32 %v715_v37, %v714_v36  ;;  %v629_v42 = vpop.f32.mrf.mxu0  ;;  %v727_v47 = vrot.slane %v726_v34, 2  ;;  %v735_v14 = vadd.f32 %v734_v56, %v733_v39  ;;  %vm816_vm9 = vcmask 1043459  }
  0xfb   : > { %v713_v45 = vsel %vm681_vm11, %v665_v33, %v697_v38  ;;  %v668_v52 = vadd.f32 %v629_v42, %v5339_v55  ;;  %v702_v58 = vmul.f32 0.01, %v670_v41  ;;  %vm686_vm12 = vcmp.ge.f32.partialorder %v670_v41, 0.0 }
  0xfc   : > { %v746_v48 = vrot.slane %v745_v40, 4  ;;  %v738_v49 = vadd.f32 %v713_v45, %v712_v44  ;;  %v4579_v53 = vpop.f32.mrf.mxu0  ;;  %v728_v0 = vadd.f32 %v727_v47, %v726_v34  ;;  %v736_v30 = vrot.slane %v735_v14, 1 }
  0xfd   : > { %v671_v54 = vadd.f32 %v4579_v53, %v5339_v55  ;;  %v700_v3 = vmul.f32 0.01, %v668_v52  ;;  %vm684_vm14 = vcmp.ge.f32.partialorder %v668_v52, 0.0  ;;  %v718_v8 = vsel %vm686_vm12, %v670_v41, %v702_v58 }
  0xfe   : > { %v739_v57 = vrot.slane %v738_v49, 4  ;;  %v632_v59 = vpop.f32.mrf.mxu0  ;;  %v747_v1 = vadd.f32 %v746_v48, %v745_v40  ;;  %v729_v20 = vrot.slane %v728_v0, 1  ;;  %v737_v43 = vadd.f32 %v736_v30, %v735_v14 }
  0xff   : > { %vm687_vm13 = vcmp.ge.f32.partialorder %v671_v54, 0.0  ;;  %v703_v61 = vmul.f32 0.01, %v671_v54  ;;  %v669_v62 = vadd.f32 %v632_v59, %v5339_v55  ;;  %v716_v18 = vsel %vm684_vm14, %v668_v52, %v700_v3 }
 0x100   : > { %v740_v2 = vadd.f32 %v739_v57, %v738_v49  ;;  %v4582_v4 = vpop.f32.mrf.mxu0  ;;  %v748_v16 = vrot.slane %v747_v1, 2  ;;  %v730_v33 = vadd.f32 %v729_v20, %v728_v0  ;;  %v781_v59 = vmul.f32 0.1, %v737_v43 }
 0x101   : > { %v719_v5 = vsel %vm687_vm13, %v671_v54, %v703_v61  ;;  %vm685_vm15 = vcmp.ge.f32.partialorder %v669_v62, 0.0  ;;  %v701_v6 = vmul.f32 0.01, %v669_v62  ;;  %v674_v9 = vadd.f32 %v4582_v4, %v5339_v55 }
 0x102   : > { %v741_v7 = vrot.slane %v740_v2, 2  ;;  %v645_v10 = vpop.f32.mrf.mxu0  ;;  %v759_v12 = vadd.f32 %v719_v5, %v718_v8  ;;  %v749_v31 = vadd.f32 %v748_v16, %v747_v1  ;;  %v780_v49 = vmul.f32 0.1, %v730_v33 }
 0x103   : > { %v717_v13 = vsel %vm685_vm15, %v669_v62, %v701_v6  ;;  %v706_v23 = vmul.f32 0.01, %v674_v9  ;;  %v672_v24 = vadd.f32 %v645_v10, %v5339_v55  ;;  %vm690_vm1 = vcmp.ge.f32.partialorder %v674_v9, 0.0 }
 0x104   : > { %v742_v17 = vadd.f32 %v741_v7, %v740_v2  ;;  %v4583_v19 = vpop.f32.mrf.mxu0  ;;  %v760_v21 = vrot.slane %v759_v12, 4  ;;  %v752_v22 = vadd.f32 %v717_v13, %v716_v18  ;;  %v750_v44 = vrot.slane %v749_v31, 1 }
 0x105   : > { %v675_v25 = vadd.f32 %v4583_v19, %v5339_v55  ;;  %v722_v37 = vsel %vm690_vm1, %v674_v9, %v706_v23  ;;  %vm688_vm5 = vcmp.ge.f32.partialorder %v672_v24, 0.0  ;;  %v704_v38 = vmul.f32 0.01, %v672_v24 }
 0x106   : > { %v648_v26 = vpop.f32.mrf.mxu0  ;;  %v743_v27 = vrot.slane %v742_v17, 1  ;;  %v761_v28 = vadd.f32 %v760_v21, %v759_v12  ;;  %v753_v29 = vrot.slane %v752_v22, 4  ;;  %v751_v60 = vadd.f32 %v750_v44, %v749_v31  ;;  %v4757_v44 = vld [vmem:[#allocation2 + $0xec] ss:$16 sps:$4 sm:$0xff]  }
 0x107   : > { %vm691_vm4 = vcmp.ge.f32.partialorder %v675_v25, 0.0  ;;  %v707_v32 = vmul.f32 0.01, %v675_v25  ;;  %v673_v36 = vadd.f32 %v648_v26, %v5339_v55  ;;  %v720_v52 = vsel %vm688_vm5, %v672_v24, %v704_v38 }
 0x108   : > { %v762_v34 = vrot.slane %v761_v28, 2  ;;  %v754_v35 = vadd.f32 %v753_v29, %v752_v22  ;;  %v744_v40 = vadd.f32 %v743_v27, %v742_v17  ;;  %v788_v1 = vpack.c.bf16 %v780_v49, %v780_v49  ;;  %v4769_v49 = vld [vmem:[#allocation2 + $0xac] ss:$16 sps:$4 sm:$0xff]  }
 0x109   : > { %v723_v39 = vsel %vm691_vm4, %v675_v25, %v707_v32  ;;  %vm689_vm6 = vcmp.ge.f32.partialorder %v673_v36, 0.0  ;;  %v705_v46 = vmul.f32 0.01, %v673_v36  ;;  %v789_v6 = vpack.c.bf16 %v781_v59, %v781_v59  ;;  %v4783_v59 = vld [vmem:[#allocation2 + $0x2c] ss:$16 sps:$4 sm:$0xff]  }
 0x10a   : > { %v755_v41 = vrot.slane %v754_v35, 2  ;;  %v773_v42 = vadd.f32 %v723_v39, %v722_v37  ;;  %v763_v45 = vadd.f32 %v762_v34, %v761_v28  ;;  %v782_v54 = vmul.f32 0.1, %v744_v40  ;;  %v4746_v39 = vld [vmem:[%s6177_s5 + $0x8] sm:$0xff]  }
 0x10b   : > { %v721_v53 = vsel %vm689_vm6, %v673_v36, %v705_v46  ;;  %v783_v7 = vmul.f32 0.1, %v751_v60  ;;  %v804_v11 = vunpack.c.l.b16 %v788_v1  ;;  %v805_v17 = vunpack.c.l.b16 %v789_v6  ;;  %v4755_v46 = vld [vmem:[#allocation2 + $0xe8] ss:$16 sps:$4 sm:$0xff]   ;;  %v4786_v60 = vld [vmem:[#allocation2 + $0xc] ss:$16 sps:$4 sm:$0xff]  }
 0x10c   : > { %v756_v47 = vadd.f32 %v755_v41, %v754_v35  ;;  %v774_v48 = vrot.slane %v773_v42, 4  ;;  %v766_v58 = vadd.f32 %v721_v53, %v720_v52  ;;  %v764_v61 = vrot.slane %v763_v45, 1  ;;  %v4774_v52 = vld [vmem:[#allocation2 + $0x8c] ss:$16 sps:$4 sm:$0xff]   ;;  %v4772_v53 = vld [vmem:[#allocation2 + $0x88] ss:$16 sps:$4 sm:$0xff]  }
 0x10d   : > { %v790_v2 = vpack.c.bf16 %v782_v54, %v782_v54  ;;  %v791_v18 = vpack.c.bf16 %v783_v7, %v783_v7  ;;  %v813_v22 = vsel %vm812_vm7, %v805_v17, %v804_v11  ;;  %vm820_vm11 = vcmask 1045509   ;;  %v4777_v54 = vld [vmem:[#allocation2 + $0x6c] ss:$16 sps:$4 sm:$0xff]   ;;  %v4795_v7 = vld [vmem:[#allocation2 + $0x128] ss:$16 sps:$4 sm:$0xff]  }
 0x10e   : > { %v757_v56 = vrot.slane %v756_v47, 1  ;;  %v775_v57 = vadd.f32 %v774_v48, %v773_v42  ;;  %v767_v0 = vrot.slane %v766_v58, 4  ;;  %v765_v8 = vadd.f32 %v764_v61, %v763_v45  ;;  %v4751_v42 = vld [vmem:[%s6177_s5] sm:$0xff]   ;;  %v4761_v48 = vld [vmem:[#allocation2 + $0xc8] ss:$16 sps:$4 sm:$0xff]  }
 0x10f   : > { %v806_v12 = vunpack.c.l.b16 %v790_v2  ;;  %v807_v26 = vunpack.c.l.b16 %v791_v18  ;;  %vm822_vm12 = vcmask 1046534   ;;  %vm824_vm13 = vcmask 1047559   ;;  %v1036_v61 = vld [vmem:[#allocation2 + $0x188] sm:$0xff]  ;;  %v4830_v11 = vld [vmem:[%s6176_s4 + $0x154] ss:$12 sps:$4 sm:$0xff]  }
 0x110   : > { %v758_v62 = vadd.f32 %v757_v56, %v756_v47  ;;  %v776_v63 = vrot.slane %v775_v57, 2  ;;  %v768_v5 = vadd.f32 %v767_v0, %v766_v58  ;;  %v785_v19 = vmul.f32 0.1, %v765_v8  ;;  %v4763_v47 = vld [vmem:[#allocation2 + $0xcc] ss:$16 sps:$4 sm:$0xff]   ;;  %1966 = vmatprep.subr.bf16.mxu0 %v4830_v11 }
 0x111   : > { %v815_v25 = vsel %vm814_vm8, %v806_v12, %v813_v22  ;;  %v917_v40 = vmul.f32 0.01, %v5339_v55  ;;  %vm916_vm14 = vcmp.ge.f32.partialorder %v5339_v55, 0.0  ;;  %vm936_vm15 = vcmask 261120   ;;  %v4775_v56 = vld [vmem:[#allocation2 + $0x68] ss:$16 sps:$4 sm:$0xff]  }
 0x112   : > { %v784_v3 = vmul.f32 0.1, %v758_v62  ;;  %v777_v4 = vadd.f32 %v776_v63, %v775_v57  ;;  %v769_v10 = vrot.slane %v768_v5, 2  ;;  %v793_v27 = vpack.c.bf16 %v785_v19, %v785_v19  ;;  %v4780_v57 = vld [vmem:[#allocation2 + $0x4c] ss:$16 sps:$4 sm:$0xff]  }
 0x113   : > { %v817_v30 = vsel %vm816_vm9, %v807_v26, %v815_v25  ;;  %v918_v43 = vsel %vm916_vm14, %v5339_v55, %v917_v40  ;;  %v4767_v55 = vld [vmem:[#allocation2 + $0xa8] ss:$16 sps:$4 sm:$0xff]   ;;  %v4045_v63 = vcombine.high %v1036_v61, %v1036_v61  ;;  %v4044_v0 = vcombine.low %v1036_v61, %v1036_v61  ;;  %v4791_v2 = vld [vmem:[#allocation2 + $0x16c] ss:$16 sps:$4 sm:$0xff]  }
 0x114   : > { %v778_v9 = vrot.slane %v777_v4, 1  ;;  %v792_v13 = vpack.c.bf16 %v784_v3, %v784_v3  ;;  %v770_v14 = vadd.f32 %v769_v10, %v768_v5  ;;  %v809_v33 = vunpack.c.l.b16 %v793_v27  ;;  %v4778_v58 = vld [vmem:[#allocation2 + $0x48] ss:$16 sps:$4 sm:$0xff]   ;;  %v4797_v6 = vld [vmem:[#allocation2 + $0x12c] ss:$16 sps:$4 sm:$0xff]  }
 0x115   : > { %v919_v45 = vpack.c.bf16 %v918_v43, %v918_v43  ;;  %v4784_v62 = vld [vmem:[#allocation2 + $0x8] ss:$16 sps:$4 sm:$0xff]   ;;  %v1325_v1 = vsel %vm559_vm0, %v4044_v0, 0  ;;  %v4800_v8 = vld [vmem:[#allocation2 + $0x10c] ss:$16 sps:$4 sm:$0xff]   ;;  %vm1944_vm7 = vcmask 130048  }
 0x116   : > { %v779_v16 = vadd.f32 %v778_v9, %v777_v4  ;;  %v771_v20 = vrot.slane %v770_v14, 1  ;;  %v808_v23 = vunpack.c.l.b16 %v792_v13  ;;  %v4789_v3 = vld [vmem:[#allocation2 + $0x168] ss:$16 sps:$4 sm:$0xff]   ;;  %v4794_v4 = vld [vmem:[#allocation2 + $0x14c] ss:$16 sps:$4 sm:$0xff]  }
 0x117   : > { %v4792_v5 = vld [vmem:[#allocation2 + $0x148] ss:$16 sps:$4 sm:$0xff]   ;;  %v4828_v10 = vld [vmem:[%s6176_s4 + $0x150] ss:$12 sps:$4 sm:$0xff]   ;;  %v4886_v11 = vld [vmem:[%s6176_s4 + $0x180] ss:$12 sps:$4 sm:$0xff]  }
 0x118   : > { %v787_v21 = vmul.f32 0.1, %v779_v16  ;;  %v772_v24 = vadd.f32 %v771_v20, %v770_v14  ;;  %v819_v32 = vsel %vm818_vm10, %v808_v23, %v817_v30  ;;  %v4798_v9 = vld [vmem:[#allocation2 + $0x108] ss:$16 sps:$4 sm:$0xff]   ;;  %1967 = vmatpush2.bf16.msra.mxu0 %v4828_v10  ;;  %v4836_v14 = vld [vmem:[%s6176_s4 + $0x124] ss:$12 sps:$4 sm:$0xff]  }
 0x119   : > { %v821_v36 = vsel %vm820_vm11, %v809_v33, %v819_v32  ;;  %v4831_v12 = vld [vmem:[%s6176_s4 + $0x138] ss:$12 sps:$4 sm:$0xff]   ;;  %v4833_v13 = vld [vmem:[%s6176_s4 + $0x13c] ss:$12 sps:$4 sm:$0xff]   ;;  %v4834_v16 = vld [vmem:[%s6176_s4 + $0x120] ss:$12 sps:$4 sm:$0xff]  }
 0x11a   : > { %v786_v28 = vmul.f32 0.1, %v772_v24  ;;  %v795_v29 = vpack.c.bf16 %v787_v21, %v787_v21  ;;  %1968 = vmatprep.subr.bf16.mxu0 %v4833_v13  ;;  %v4839_v18 = vld [vmem:[%s6176_s4 + $0x10c] ss:$12 sps:$4 sm:$0xff]   ;;  %v4837_v19 = vld [vmem:[%s6176_s4 + $0x108] ss:$12 sps:$4 sm:$0xff]  }
 0x11b   : > { %v4842_v20 = vld [vmem:[%s6176_s4 + $0xf4] ss:$12 sps:$4 sm:$0xff]   ;;  %v4840_v21 = vld [vmem:[%s6176_s4 + $0xf0] ss:$12 sps:$4 sm:$0xff]  }
 0x11c   : > { %v794_v31 = vpack.c.bf16 %v786_v28, %v786_v28  ;;  %v811_v35 = vunpack.c.l.b16 %v795_v29  ;;  %1969 = vmatpush2.bf16.msra.mxu0 %v4831_v12  ;;  %v5457_v22 = vld [vmem:[%s6178_s6 + $0x1] ss:$8 sm:$0xf]  ;;  %v1364_v33 = vpop.f32.mrf.mxu0 }
 0x11d   : > { %1970 = vmatprep.subr.bf16.mxu0 %v4836_v14  ;;  %v4845_v25 = vld [vmem:[%s6176_s4 + $0xdc] ss:$12 sps:$4 sm:$0xff]   ;;  %v4853_v28 = vld [vmem:[%s6176_s4 + $0x22c] ss:$12 sps:$4 sm:$0xff]   ;;  %v4858_v30 = vld [vmem:[%s6176_s4 + $0x214] ss:$12 sps:$4 sm:$0xff]  }
 0x11e   : > { %v810_v34 = vunpack.c.l.b16 %v794_v31  ;;  %v4851_v26 = vld [vmem:[%s6176_s4 + $0x228] ss:$12 sps:$4 sm:$0xff]   ;;  %v4843_v29 = vld [vmem:[%s6176_s4 + $0xd8] ss:$12 sps:$4 sm:$0xff]   ;;  %v4876_v61 = vld [vmem:[%s6176_s4 + $0x1b0] ss:$12 sps:$4 sm:$0xff]  }
 0x11f   : > { %v4848_v32 = vld [vmem:[%s6176_s4 + $0xc4] ss:$12 sps:$4 sm:$0xff]   ;;  %v4865_v0 = vld [vmem:[%s6176_s4 + $0x68] ss:$12 sps:$4 sm:$0xff]   ;;  %v4889_v13 = vld [vmem:[%s6176_s4 + $0x240] ss:$12 sps:$4 sm:$0xff]  }
 0x120   : > { %v823_v37 = vsel %vm822_vm12, %v810_v34, %v821_v36  ;;  %1971 = vmatpush2.bf16.msra.mxu0 %v4834_v16  ;;  %v4856_v34 = vld [vmem:[%s6176_s4 + $0x210] ss:$12 sps:$4 sm:$0xff]   ;;  %v5180_v16 = vmov 0  }
 0x121   : > { %v825_v38 = vsel %vm824_vm13, %v811_v35, %v823_v37  ;;  %1972 = vmatprep.subr.bf16.mxu0 %v4839_v18  ;;  %v4863_v36 = vld [vmem:[%s6176_s4 + $0x1fc] ss:$12 sps:$4 sm:$0xff]   ;;  %v1366_v37 = vpop.f32.mrf.mxu0  ;;  %v4888_v10 = vld [vmem:[%s6176_s4 + $0x184] ss:$12 sps:$4 sm:$0xff]  }
 0x122   : > { %v826_v41 = vpack.c.b16 %v825_v38, %v825_v38  ;;  %v4846_v38 = vld [vmem:[%s6176_s4 + $0xc0] ss:$12 sps:$4 sm:$0xff]   ;;  %v4891_v12 = vld [vmem:[%s6176_s4 + $0x244] ss:$12 sps:$4 sm:$0xff]  }
 0x123   : > { %v1368_v43 = vpop.f32.mrf.mxu0  ;;  %v4892_v14 = vld [vmem:[#allocation2 + $0x270] ss:$16 sps:$4 sm:$0xff]  }
 0x124   : > { %4601 = vmatmul.mubr.bf16.vlgmr.msra.gmra.mxu1 %v826_v41  ;;  %1973 = vmatpush2.bf16.msra.mxu0 %v4837_v19  ;;  %v4849_v41 = vld [vmem:[%s6176_s4 + $0x170] ss:$12 sps:$4 sm:$0xff]   ;;  %v4898_v19 = vld [vmem:[#allocation2 + $0x254] ss:$16 sps:$4 sm:$0xff]  }
 0x125   : > { %4605 = vmatpush3.bf16.msra.mxu1 %v4746_v39  ;;  %4608 = vmatprep.mubr.msk.bf16.mxu1 %vm5179_vm2, %v5178_v15  ;;  %v4896_v18 = vld [vmem:[#allocation2 + $0x250] ss:$16 sps:$4 sm:$0xff]  }
 0x126   : > { %4606 = vmatprep.subr.bf16.mxu1 %v5178_v15  ;;  %1974 = vmatprep.subr.bf16.mxu0 %v4842_v20  ;;  %v4900_v20 = vld [vmem:[#allocation2 + $0x230] ss:$16 sps:$4 sm:$0xff]  }
 0x127   : > { %v4939_v43 = vld [vmem:[#allocation2 + $0x2b0] ss:$16 sps:$4 sm:$0xff]  }
 0x128   : > { %1975 = vmatpush2.bf16.msra.mxu0 %v4840_v21  ;;  %v4902_v21 = vld [vmem:[#allocation2 + $0x234] ss:$16 sps:$4 sm:$0xff]  }
 0x129   : > { %4607 = vmatpush3.bf16.msra.mxu1 %v4751_v42  ;;  %1976 = vmatprep.subr.bf16.mxu0 %v4845_v25  ;;  %v4861_v42 = vld [vmem:[%s6176_s4 + $0x1f8] ss:$12 sps:$4 sm:$0xff]   ;;  %v4904_v25 = vld [vmem:[#allocation2 + $0x210] ss:$16 sps:$4 sm:$0xff]  }
 0x12a   : > { %1371 = vmatprep.subr.bf16.mxu1 %v4757_v44 }
 0x12c   : > { %4609 = vmatmul.mubr.msk.bf16.vlgmr.msra.gmra.mxu1 %vm936_vm15, %v919_v45  ;;  %1977 = vmatpush2.bf16.msra.mxu0 %v4843_v29  ;;  %v4912_v29 = vld [vmem:[#allocation2 + $0x1d0] ss:$16 sps:$4 sm:$0xff]  }
 0x12d   : > { %1372 = vmatpush1.bf16.msra.mxu1 %v4755_v46  ;;  %4049 = vmatprep.mubr.msk.bf16.mxu1 %vm1314_vm3, %v5322_v51  ;;  %v4781_v51 = vld [vmem:[#allocation2 + $0x28] ss:$16 sps:$4 sm:$0xff]   ;;  %v4868_v46 = vld [vmem:[%s6176_s4 + $0x1e4] ss:$12 sps:$4 sm:$0xff]  }
 0x12e   : > { %1373 = vmatprep.subr.bf16.mxu1 %v4763_v47  ;;  %1978 = vmatprep.subr.bf16.mxu0 %v4848_v32  ;;  %v1369_v47 = vpop.f32.mrf.mxu0  ;;  %v4918_v32 = vld [vmem:[#allocation2 + $0x1b4] ss:$16 sps:$4 sm:$0xff]  }
 0x12f   : > { %v2119_v47 = vld [vmem:[%s5317_s20 + $0x8] sm:$0xff] }
 0x130   : > { %1979 = vmatpush2.bf16.msra.mxu0 %v4846_v38 }
 0x131   : > { %1374 = vmatpush1.bf16.msra.mxu1 %v4761_v48  ;;  %4446 = vmatprep.subr.bf16.mxu0 %v4849_v41  ;;  %v4933_v41 = vld [vmem:[#allocation2 + $0x2d0] ss:$16 sps:$4 sm:$0xff]  }
 0x132   : > { %1375 = vmatprep.subr.bf16.mxu1 %v4769_v49 }
 0x135   : > { %1376 = vmatpush1.bf16.msra.mxu1 %v4767_v55 }
 0x136   : > { %1377 = vmatprep.subr.bf16.mxu1 %v4774_v52  ;;  %v4850_v52 = vld [vmem:[%s6176_s4 + $0xb0] ss:$12 sps:$4 sm:$0xff]  }
 0x139   : > { %1378 = vmatpush1.bf16.msra.mxu1 %v4772_v53  ;;  %v4866_v53 = vld [vmem:[%s6176_s4 + $0x1e0] ss:$12 sps:$4 sm:$0xff]  }
 0x13a   : > { %1379 = vmatprep.subr.bf16.mxu1 %v4777_v54  ;;  %v4854_v54 = vld [vmem:[%s6176_s4 + $0x158] ss:$12 sps:$4 sm:$0xff]  }
 0x13d   : > { %1380 = vmatpush1.bf16.msra.mxu1 %v4775_v56  ;;  %v4873_v56 = vld [vmem:[%s6176_s4 + $0x1cc] ss:$12 sps:$4 sm:$0xff]  }
 0x13e   : > { %1381 = vmatprep.subr.bf16.mxu1 %v4780_v57  ;;  %v4855_v57 = vld [vmem:[%s6176_s4 + $0x98] ss:$12 sps:$4 sm:$0xff]  }
 0x141   : > { %1382 = vmatpush1.bf16.msra.mxu1 %v4778_v58  ;;  %v4871_v58 = vld [vmem:[%s6176_s4 + $0x1c8] ss:$12 sps:$4 sm:$0xff]  }
 0x142   : > { %1383 = vmatprep.subr.bf16.mxu1 %v4783_v59  ;;  %v4859_v59 = vld [vmem:[%s6176_s4 + $0x140] ss:$12 sps:$4 sm:$0xff]  }
 0x145   : > { %1384 = vmatpush1.bf16.msra.mxu1 %v4781_v51  ;;  %v4878_v51 = vld [vmem:[%s6176_s4 + $0x1b4] ss:$12 sps:$4 sm:$0xff]  }
 0x146   : > { %1385 = vmatprep.subr.bf16.mxu1 %v4786_v60  ;;  %v4860_v60 = vld [vmem:[%s6176_s4 + $0x80] ss:$12 sps:$4 sm:$0xff]  }
 0x149   : > { %1386 = vmatpush1.bf16.msra.mxu1 %v4784_v62  ;;  %v4864_v62 = vld [vmem:[%s6176_s4 + $0x128] ss:$12 sps:$4 sm:$0xff]  }
 0x14a   : > { %4048 = vmatprep.subr.msk.bf16.mxu1 %vm559_vm0, %v4045_v63  ;;  %v4883_v63 = vld [vmem:[%s6176_s4 + $0x19c] ss:$12 sps:$4 sm:$0xff]  }
 0x14d   : > { %1394 = vmatpush2.bf16.msra.mxu1 %v1325_v1  ;;  %v4881_v1 = vld [vmem:[%s6176_s4 + $0x198] ss:$12 sps:$4 sm:$0xff]  }
 0x14e   : > { %1395 = vmatprep.subr.bf16.mxu1 %v4791_v2  ;;  %v4869_v2 = vld [vmem:[%s6176_s4 + $0x110] ss:$12 sps:$4 sm:$0xff]  }
 0x151   : > { %1396 = vmatpush2.bf16.msra.mxu1 %v4789_v3  ;;  %v4870_v3 = vld [vmem:[%s6176_s4 + $0x50] ss:$12 sps:$4 sm:$0xff]  }
 0x152   : > { %1397 = vmatprep.subr.bf16.mxu1 %v4794_v4  ;;  %v4874_v4 = vld [vmem:[%s6176_s4 + $0xf8] ss:$12 sps:$4 sm:$0xff]  }
 0x155   : > { %1398 = vmatpush2.bf16.msra.mxu1 %v4792_v5  ;;  %v4875_v5 = vld [vmem:[%s6176_s4 + $0x38] ss:$12 sps:$4 sm:$0xff]  }
 0x156   : > { %1399 = vmatprep.subr.bf16.mxu1 %v4797_v6  ;;  %v4879_v6 = vld [vmem:[%s6176_s4 + $0xe0] ss:$12 sps:$4 sm:$0xff]  }
 0x159   : > { %1400 = vmatpush2.bf16.msra.mxu1 %v4795_v7  ;;  %v4880_v7 = vld [vmem:[%s6176_s4 + $0x20] ss:$12 sps:$4 sm:$0xff]  }
 0x15a   : > { %1401 = vmatprep.subr.bf16.mxu1 %v4800_v8  ;;  %v4884_v8 = vld [vmem:[%s6176_s4 + $0xc8] ss:$12 sps:$4 sm:$0xff]  }
 0x15d   : > { %1402 = vmatpush2.bf16.msra.mxu1 %v4798_v9  ;;  %v4885_v9 = vld [vmem:[%s6176_s4 + $0x8] ss:$12 sps:$4 sm:$0xff]  }
 0x15e   : > { %1989 = vmatprep.subr.bf16.mxu1 %v4853_v28  ;;  %v4910_v28 = vld [vmem:[#allocation2 + $0x1f4] ss:$16 sps:$4 sm:$0xff]  }
 0x160   : > { %1404 = vmatmul.mubr.bf16.vlgmr.msra.gmra.mxu1 %v5320_v50  ;;  %v981_v50 = vlaneseq }
 0x161   : > { %1990 = vmatpush1.bf16.msra.mxu1 %v4851_v26  ;;  %v4906_v26 = vld [vmem:[#allocation2 + $0x214] ss:$16 sps:$4 sm:$0xff]  }
 0x162   : > { %v5440_v17 = vshrl.u32 %v981_v50, 7  ;;  %1991 = vmatprep.subr.bf16.mxu1 %v4858_v30  ;;  %v4894_v50 = vld [vmem:[#allocation2 + $0x274] ss:$16 sps:$4 sm:$0xff]  }
 0x163   : > { %v4914_v30 = vld [vmem:[#allocation2 + $0x1d4] ss:$16 sps:$4 sm:$0xff]  }
 0x164   : > { %v5460_v23 = vsub.s32 0, %v5440_v17  ;;  %v5463_v24 = vsub.s32 1, %v5440_v17 }
 0x165   : > { %1992 = vmatpush1.bf16.msra.mxu1 %v4856_v34  ;;  %v4922_v34 = vld [vmem:[#allocation2 + $0x194] ss:$16 sps:$4 sm:$0xff]  }
 0x166   : > { %v1041_v27 = vrot.slane %v5457_v22, %v5460_v23  ;;  %v1045_v31 = vrot.slane %v5457_v22, %v5463_v24  ;;  %1993 = vmatprep.subr.bf16.mxu1 %v4863_v36 }
 0x168   : > { %v1365_v35 = vadd.f32 %v1364_v33, %v1041_v27  ;;  %v1367_v40 = vadd.f32 %v1366_v37, %v1045_v31  ;;  %v4908_v27 = vld [vmem:[#allocation2 + $0x1f0] ss:$16 sps:$4 sm:$0xff]  }
 0x169   : > { %1994 = vmatpush1.bf16.msra.mxu1 %v4861_v42  ;;  %v4916_v31 = vld [vmem:[#allocation2 + $0x1b0] ss:$16 sps:$4 sm:$0xff]   ;;  %v4935_v42 = vld [vmem:[#allocation2 + $0x2d4] ss:$16 sps:$4 sm:$0xff]  }
 0x16a   : > { %vm1412_vm1 = vcmp.ge.f32.partialorder %v1365_v35, 0.0  ;;  %v1416_v39 = vmul.f32 0.01, %v1365_v35  ;;  %vm1413_vm4 = vcmp.ge.f32.partialorder %v1367_v40, 0.0  ;;  %v1417_v45 = vmul.f32 0.01, %v1367_v40  ;;  %1995 = vmatprep.subr.bf16.mxu1 %v4868_v46 }
 0x16b   : > { %v4920_v33 = vld [vmem:[#allocation2 + $0x190] ss:$16 sps:$4 sm:$0xff]   ;;  %v4947_v46 = vld [vmem:[#allocation2 + $0x294] ss:$16 sps:$4 sm:$0xff]  }
 0x16c   : > { %v1420_v44 = vsel %vm1412_vm1, %v1365_v35, %v1416_v39  ;;  %v1421_v49 = vsel %vm1413_vm4, %v1367_v40, %v1417_v45  ;;  %v2169_v35 = vld [vmem:[#allocation2 + $0x310] sm:$0xff]  ;;  %vm3722_vm1 = vcmask 1042432   ;;  %vm3718_vm4 = vcmask 179200  }
 0x16d   : > { %v1424_v48 = vpack.c.bf16 %v1420_v44, %v1420_v44  ;;  %v1425_v55 = vpack.c.bf16 %v1421_v49, %v1421_v49  ;;  %1996 = vmatpush1.bf16.msra.mxu1 %v4866_v53  ;;  %v4178_v36 = vcombine.high %v2169_v35, %v2169_v35  ;;  %v4177_v37 = vcombine.low %v2169_v35, %v2169_v35  ;;  %v4929_v39 = vld [vmem:[#allocation2 + $0x2f4] ss:$16 sps:$4 sm:$0xff]   ;;  %v4927_v40 = vld [vmem:[#allocation2 + $0x2f0] ss:$16 sps:$4 sm:$0xff]   ;;  %v4938_v35 = vld [vmem:[#allocation2 + $0x25c] ss:$16 sps:$4 sm:$0xff]  }
 0x16e   : > { %1997 = vmatprep.subr.bf16.mxu1 %v4873_v56  ;;  %v4941_v44 = vld [vmem:[#allocation2 + $0x2b4] ss:$16 sps:$4 sm:$0xff]   ;;  %v4945_v45 = vld [vmem:[#allocation2 + $0x290] ss:$16 sps:$4 sm:$0xff]   ;;  %v5589_v49 = vcombine.low %v2119_v47, %v2119_v47 }
 0x16f   : > { %1980 = vmatprep.mubr.bf16.mxu0 %v1425_v55  ;;  %v2452_v38 = vsel %vm559_vm0, %v4177_v37, 0  ;;  %v4944_v37 = vld [vmem:[#allocation2 + $0x23c] ss:$16 sps:$4 sm:$0xff]  }
 0x170   : > { %1981 = vmatmul.mubr.bf16.vlgmr.msra.gmra.mxu0 %v1424_v48 }
 0x171   : > { %4447 = vmatpush3.bf16.msra.mxu0 %v4850_v52  ;;  %2062 = vmatprep.mubr.bf16.mxu0 %v1425_v55 }
 0x172   : > { %4448 = vmatprep.subr.bf16.mxu0 %v4854_v54  ;;  %1998 = vmatpush1.bf16.msra.mxu1 %v4871_v58 }
 0x173   : > { %1999 = vmatprep.subr.bf16.mxu1 %v4878_v51 }
 0x175   : > { %4449 = vmatpush3.bf16.msra.mxu0 %v4855_v57 }
 0x176   : > { %4450 = vmatprep.subr.bf16.mxu0 %v4859_v59  ;;  %2000 = vmatpush1.bf16.msra.mxu1 %v4876_v61 }
 0x177   : > { %2001 = vmatprep.subr.bf16.mxu1 %v4883_v63  ;;  %v4981_v63 = vld [vmem:[%s6176_s4 + $0x304] ss:$12 sps:$4 sm:$0xff]  }
 0x179   : > { %4451 = vmatpush3.bf16.msra.mxu0 %v4860_v60 }
 0x17a   : > { %4452 = vmatprep.subr.bf16.mxu0 %v4864_v62  ;;  %2002 = vmatpush1.bf16.msra.mxu1 %v4881_v1  ;;  %v4979_v62 = vld [vmem:[%s6176_s4 + $0x300] ss:$12 sps:$4 sm:$0xff]   ;;  %v1052_v1 = vsub.s32 3, %v5440_v17 }
 0x17b   : > { %2003 = vmatprep.subr.bf16.mxu1 %v4888_v10 }
 0x17d   : > { %4453 = vmatpush3.bf16.msra.mxu0 %v4865_v0  ;;  %v5604_v0 = vsub.s32 2, %v5440_v17  ;;  %v5065_v17 = vld [vmem:[%s6177_s5 + $0xf8] sm:$0xff]  }
 0x17e   : > { %4454 = vmatprep.subr.bf16.mxu0 %v4869_v2  ;;  %2004 = vmatpush1.bf16.msra.mxu1 %v4886_v11 }
 0x17f   : > { %2019 = vmatprep.subr.bf16.mxu1 %v4891_v12  ;;  %v1049_v2 = vrot.slane %v5457_v22, %v5604_v0 }
 0x181   : > { %4455 = vmatpush3.bf16.msra.mxu0 %v4870_v3  ;;  %v1053_v3 = vrot.slane %v5457_v22, %v1052_v1  ;;  %v4899_v22 = vld [vmem:[%s6176_s4 + $0x218] ss:$12 sps:$4 sm:$0xff]  }
 0x182   : > { %4456 = vmatprep.subr.bf16.mxu0 %v4874_v4  ;;  %2020 = vmatpush2.bf16.msra.mxu1 %v4889_v13 }
 0x183   : > { %2070 = vmatprep.subr.bf16.mxu1 %v5180_v16 }
 0x185   : > { %4457 = vmatpush3.bf16.msra.mxu0 %v4875_v5 }
 0x186   : > { %4458 = vmatprep.subr.bf16.mxu0 %v4879_v6 }
 0x189   : > { %4459 = vmatpush3.bf16.msra.mxu0 %v4880_v7 }
 0x18a   : > { %4460 = vmatprep.subr.bf16.mxu0 %v4884_v8 }
 0x18d   : > { %4461 = vmatpush3.bf16.msra.mxu0 %v4885_v9 }
 0x18e   : > { %2463 = vmatprep.subr.bf16.mxu0 %v4894_v50 }
 0x190   : > { %2063 = vmatmul.mubr.bf16.vlgmr.msra.gmra.mxu0 %v1424_v48  ;;  %v5587_v48 = vcombine.high %v2119_v47, %v2119_v47 }
 0x191   : > { %2464 = vmatpush1.bf16.msra.mxu0 %v4892_v14  ;;  %v4895_v14 = vld [vmem:[%s6176_s4 + $0x230] ss:$12 sps:$4 sm:$0xff]  }
 0x192   : > { %2465 = vmatprep.subr.bf16.mxu0 %v4898_v19  ;;  %4182 = vmatprep.mubr.msk.bf16.mxu0 %vm1314_vm3, %v5587_v48  ;;  %v4903_v19 = vld [vmem:[%s6176_s4 + $0x200] ss:$12 sps:$4 sm:$0xff]  }
 0x195   : > { %2466 = vmatpush1.bf16.msra.mxu0 %v4896_v18 }
 0x196   : > { %2467 = vmatprep.subr.bf16.mxu0 %v4902_v21  ;;  %v4911_v21 = vld [vmem:[%s6176_s4 + $0x1d0] ss:$12 sps:$4 sm:$0xff]  }
 0x199   : > { %2468 = vmatpush1.bf16.msra.mxu0 %v4900_v20  ;;  %v4907_v20 = vld [vmem:[%s6176_s4 + $0x1e8] ss:$12 sps:$4 sm:$0xff]  }
 0x19a   : > { %2469 = vmatprep.subr.bf16.mxu0 %v4906_v26  ;;  %v4919_v26 = vld [vmem:[%s6176_s4 + $0x1a0] ss:$12 sps:$4 sm:$0xff]  }
 0x19d   : > { %2470 = vmatpush1.bf16.msra.mxu0 %v4904_v25  ;;  %v4915_v25 = vld [vmem:[%s6176_s4 + $0x1b8] ss:$12 sps:$4 sm:$0xff]  }
 0x19e   : > { %2471 = vmatprep.subr.bf16.mxu0 %v4910_v28 }
 0x1a1   : > { %2472 = vmatpush1.bf16.msra.mxu0 %v4908_v27  ;;  %v4923_v27 = vld [vmem:[%s6176_s4 + $0x188] ss:$12 sps:$4 sm:$0xff]  }
 0x1a2   : > { %2473 = vmatprep.subr.bf16.mxu0 %v4914_v30  ;;  %v4925_v30 = vld [vmem:[%s6176_s4 + $0x248] ss:$12 sps:$4 sm:$0xff]  }
 0x1a5   : > { %2474 = vmatpush1.bf16.msra.mxu0 %v4912_v29 }
 0x1a6   : > { %2475 = vmatprep.subr.bf16.mxu0 %v4918_v32  ;;  %v4932_v32 = vld [vmem:[#allocation2 + $0x27c] ss:$16 sps:$4 sm:$0xff]  }
 0x1a9   : > { %2476 = vmatpush1.bf16.msra.mxu0 %v4916_v31 }
 0x1aa   : > { %2477 = vmatprep.subr.bf16.mxu0 %v4922_v34  ;;  %v4930_v34 = vld [vmem:[#allocation2 + $0x278] ss:$16 sps:$4 sm:$0xff]  }
 0x1ad   : > { %2478 = vmatpush1.bf16.msra.mxu0 %v4920_v33 }
 0x1ae   : > { %4181 = vmatprep.subr.msk.bf16.mxu0 %vm559_vm0, %v4178_v36  ;;  %v4936_v36 = vld [vmem:[#allocation2 + $0x258] ss:$16 sps:$4 sm:$0xff]  }
 0x1b1   : > { %2486 = vmatpush2.bf16.msra.mxu0 %v2452_v38  ;;  %v4942_v38 = vld [vmem:[#allocation2 + $0x238] ss:$16 sps:$4 sm:$0xff]  }
 0x1b2   : > { %2487 = vmatprep.subr.bf16.mxu0 %v4929_v39  ;;  %v4950_v39 = vld [vmem:[#allocation2 + $0x21c] ss:$16 sps:$4 sm:$0xff]  }
 0x1b5   : > { %2488 = vmatpush2.bf16.msra.mxu0 %v4927_v40  ;;  %v4948_v40 = vld [vmem:[#allocation2 + $0x218] ss:$16 sps:$4 sm:$0xff]  }
 0x1b6   : > { %2489 = vmatprep.subr.bf16.mxu0 %v4935_v42  ;;  %v4953_v42 = vld [vmem:[#allocation2 + $0x1f8] ss:$16 sps:$4 sm:$0xff]  }
 0x1b9   : > { %2490 = vmatpush2.bf16.msra.mxu0 %v4933_v41  ;;  %v4955_v41 = vld [vmem:[#allocation2 + $0x1fc] ss:$16 sps:$4 sm:$0xff]  }
 0x1ba   : > { %2491 = vmatprep.subr.bf16.mxu0 %v4941_v44  ;;  %v4956_v44 = vld [vmem:[#allocation2 + $0x1d8] ss:$16 sps:$4 sm:$0xff]  }
 0x1bd   : > { %2492 = vmatpush2.bf16.msra.mxu0 %v4939_v43  ;;  %v4958_v43 = vld [vmem:[#allocation2 + $0x1dc] ss:$16 sps:$4 sm:$0xff]  }
 0x1be   : > { %2493 = vmatprep.subr.bf16.mxu0 %v4947_v46  ;;  %v4959_v46 = vld [vmem:[#allocation2 + $0x1b8] ss:$16 sps:$4 sm:$0xff]  }
 0x1c1   : > { %2494 = vmatpush2.bf16.msra.mxu0 %v4945_v45  ;;  %v4961_v45 = vld [vmem:[#allocation2 + $0x1bc] ss:$16 sps:$4 sm:$0xff]  }
 0x1c2   : > { %3081 = vmatprep.subr.bf16.mxu0 %v4981_v63  ;;  %v4969_v63 = vld [vmem:[#allocation2 + $0x2fc] ss:$16 sps:$4 sm:$0xff]  }
 0x1c4   : > { %2496 = vmatmul.mubr.bf16.vlgmr.msra.gmra.mxu0 %v5589_v49 }
 0x1c5   : > { %3082 = vmatpush1.bf16.msra.mxu0 %v4979_v62 }
 0x1e4   : > { %v910_v55 = vpop.f32.mrf.mxu1 }
 0x1e6   : > { %v4602_v52 = vpop.f32.mrf.mxu1 }
 0x1e8   : > { %v913_v53 = vpop.f32.mrf.mxu1 }
 0x1ea   : > { %v4603_v54 = vpop.f32.mrf.mxu1 }
 0x1eb   : > { %v4962_v54 = vld [vmem:[#allocation2 + $0x198] ss:$16 sps:$4 sm:$0xff]  }
 0x1ec   : > { %v974_v56 = vpop.f32.mrf.mxu1 }
 0x1ed   : > { %v980_v57 = vmul.f32 5.4, %v974_v56 }
 0x1ee   : > { %v4610_v58 = vpop.f32.mrf.mxu1 }
 0x1ef   : > { %v984_v59 = vrot.slane %v980_v57, %v5460_v23 }
 0x1f0   : > { %v977_v51 = vpop.f32.mrf.mxu1 }
 0x1f1   : > { %v5595_v60 = vsub.f32 %v910_v55, %v984_v59  ;;  %v2170_v55 = vld [vmem:[#allocation2 + $0x318] sm:$0xff] }
 0x1f2   : > { %v4611_v61 = vpop.f32.mrf.mxu1  ;;  %v4180_v57 = vcombine.high %v2170_v55, %v2170_v55  ;;  %v4179_v58 = vcombine.low %v2170_v55, %v2170_v55  ;;  %v4984_v51 = vld [vmem:[%s6176_s4 + $0x2ec] ss:$12 sps:$4 sm:$0xff]   ;;  %v5026_v55 = vld [vmem:[%s6176_s4 + $0x31c] ss:$12 sps:$4 sm:$0xff]  }
 0x1f3   : > { %v4982_v61 = vld [vmem:[%s6176_s4 + $0x2e8] ss:$12 sps:$4 sm:$0xff]   ;;  %3083 = vmatprep.subr.bf16.mxu0 %v4984_v51  ;;  %v5024_v51 = vld [vmem:[%s6176_s4 + $0x318] ss:$12 sps:$4 sm:$0xff]  }
 0x1f4   : > { %v2458_v62 = vsel %vm559_vm0, %v4179_v58, 0  ;;  %3084 = vmatpush1.bf16.msra.mxu0 %v4982_v61  ;;  %v5039_v61 = vld [vmem:[%s6176_s4 + $0x438] ss:$12 sps:$4 sm:$0xff]  }
 0x220   : > { %v1405_v4 = vpop.f32.mrf.mxu1 }
 0x221   : > { %v1406_v5 = vadd.f32 %v1405_v4, %v1049_v2  ;;  %v4987_v2 = vld [vmem:[%s6176_s4 + $0x2d4] ss:$12 sps:$4 sm:$0xff]   ;;  %v4985_v4 = vld [vmem:[%s6176_s4 + $0x2d0] ss:$12 sps:$4 sm:$0xff]  }
 0x222   : > { %v1407_v6 = vpop.f32.mrf.mxu1  ;;  %3085 = vmatprep.subr.bf16.mxu0 %v4987_v2 }
 0x223   : > { %vm1414_vm5 = vcmp.ge.f32.partialorder %v1406_v5, 0.0  ;;  %v1418_v7 = vmul.f32 0.01, %v1406_v5  ;;  %v1408_v8 = vadd.f32 %v1407_v6, %v1053_v3  ;;  %v4967_v3 = vld [vmem:[#allocation2 + $0x2f8] ss:$16 sps:$4 sm:$0xff]   ;;  %3086 = vmatpush1.bf16.msra.mxu0 %v4985_v4 }
 0x224   : > { %v1409_v9 = vpop.f32.mrf.mxu1  ;;  %v4990_v6 = vld [vmem:[%s6176_s4 + $0x2bc] ss:$12 sps:$4 sm:$0xff]  }
 0x225   : > { %vm1415_vm6 = vcmp.ge.f32.partialorder %v1408_v8, 0.0  ;;  %v1419_v10 = vmul.f32 0.01, %v1408_v8  ;;  %v1422_v11 = vsel %vm1414_vm5, %v1406_v5, %v1418_v7  ;;  %v4972_v5 = vld [vmem:[#allocation2 + $0x2dc] ss:$16 sps:$4 sm:$0xff]   ;;  %3087 = vmatprep.subr.bf16.mxu0 %v4990_v6 }
 0x226   : > { %v1410_v12 = vpop.f32.mrf.mxu1  ;;  %v1426_v18 = vpack.c.bf16 %v1422_v11, %v1422_v11  ;;  %v4988_v7 = vld [vmem:[%s6176_s4 + $0x2b8] ss:$12 sps:$4 sm:$0xff]   ;;  %v4991_v11 = vld [vmem:[%s6176_s4 + $0x2a0] ss:$12 sps:$4 sm:$0xff]  }
 0x227   : > { %v1423_v13 = vsel %vm1415_vm6, %v1408_v8, %v1419_v10  ;;  %v4993_v8 = vld [vmem:[%s6176_s4 + $0x2a4] ss:$12 sps:$4 sm:$0xff]   ;;  %v4970_v9 = vld [vmem:[#allocation2 + $0x2d8] ss:$16 sps:$4 sm:$0xff]   ;;  %v4975_v10 = vld [vmem:[#allocation2 + $0x2bc] ss:$16 sps:$4 sm:$0xff]   ;;  %3088 = vmatpush1.bf16.msra.mxu0 %v4988_v7 }
 0x228   : > { %v1427_v50 = vpack.c.bf16 %v1423_v13, %v1423_v13  ;;  %3089 = vmatprep.subr.bf16.mxu0 %v4993_v8  ;;  %v4996_v12 = vld [vmem:[%s6176_s4 + $0x28c] ss:$12 sps:$4 sm:$0xff]   ;;  %v5030_v8 = vld [vmem:[%s6176_s4 + $0x488] ss:$12 sps:$4 sm:$0xff]   ;;  %vm3806_vm6 = vcmask 785408  }
 0x229   : > { %v4973_v13 = vld [vmem:[#allocation2 + $0x2b8] ss:$16 sps:$4 sm:$0xff]  }
 0x22a   : > { %4125 = vmatprep.mubr.msk.bf16.mxu1 %vm1944_vm7, %v1427_v50 }
 0x22b   : > { %2022 = vmatmul.mubr.bf16.vlgmr.msra.gmra.mxu1 %v1426_v18  ;;  %3090 = vmatpush1.bf16.msra.mxu0 %v4991_v11  ;;  %v5034_v11 = vld [vmem:[%s6176_s4 + $0x470] ss:$12 sps:$4 sm:$0xff]  }
 0x22c   : > { %2071 = vmatpush1.bf16.msra.mxu1 %v4895_v14  ;;  %4126 = vmatprep.mubr.msk.bf16.mxu1 %vm1944_vm7, %v1427_v50  ;;  %v4978_v50 = vld [vmem:[#allocation2 + $0x29c] ss:$16 sps:$4 sm:$0xff]   ;;  %v4994_v14 = vld [vmem:[%s6176_s4 + $0x288] ss:$12 sps:$4 sm:$0xff]  }
 0x22d   : > { %2072 = vmatprep.subr.bf16.mxu1 %v5180_v16  ;;  %3091 = vmatprep.subr.bf16.mxu0 %v4996_v12  ;;  %v5047_v12 = vld [vmem:[%s6176_s4 + $0x408] ss:$12 sps:$4 sm:$0xff]  }
 0x22f   : > { %3092 = vmatpush1.bf16.msra.mxu0 %v4994_v14  ;;  %v5051_v14 = vld [vmem:[%s6176_s4 + $0x3f0] ss:$12 sps:$4 sm:$0xff]  }
 0x230   : > { %2073 = vmatpush1.bf16.msra.mxu1 %v4899_v22  ;;  %v5644_v28 = vpop.f32.mrf.mxu0  ;;  %v4976_v22 = vld [vmem:[#allocation2 + $0x298] ss:$16 sps:$4 sm:$0xff]  }
 0x231   : > { %2074 = vmatprep.subr.bf16.mxu1 %v5180_v16 }
 0x232   : > { %v5647_v29 = vpop.f32.mrf.mxu0 }
 0x234   : > { %2075 = vmatpush1.bf16.msra.mxu1 %v4903_v19  ;;  %v1986_v31 = vpop.f32.mrf.mxu0  ;;  %v4997_v19 = vld [vmem:[%s6176_s4 + $0x270] ss:$12 sps:$4 sm:$0xff]  }
 0x235   : > { %2076 = vmatprep.subr.bf16.mxu1 %v5180_v16  ;;  %v5009_v31 = vld [vmem:[%s6176_s4 + $0x390] ss:$12 sps:$4 sm:$0xff]  }
 0x236   : > { %v1987_v33 = vpop.f32.mrf.mxu0 }
 0x237   : > { %v5012_v33 = vld [vmem:[%s6176_s4 + $0x378] ss:$12 sps:$4 sm:$0xff]  }
 0x238   : > { %2077 = vmatpush1.bf16.msra.mxu1 %v4907_v20  ;;  %v5002_v20 = vld [vmem:[%s6176_s4 + $0x25c] ss:$12 sps:$4 sm:$0xff]  }
 0x239   : > { %2078 = vmatprep.subr.bf16.mxu1 %v5180_v16 }
 0x23c   : > { %2079 = vmatpush1.bf16.msra.mxu1 %v4911_v21  ;;  %v5000_v21 = vld [vmem:[%s6176_s4 + $0x258] ss:$12 sps:$4 sm:$0xff]  }
 0x23d   : > { %2080 = vmatprep.subr.bf16.mxu1 %v5180_v16 }
 0x240   : > { %2081 = vmatpush1.bf16.msra.mxu1 %v4915_v25  ;;  %v5005_v25 = vld [vmem:[%s6176_s4 + $0x3c4] ss:$12 sps:$4 sm:$0xff]  }
 0x241   : > { %2082 = vmatprep.subr.bf16.mxu1 %v5180_v16 }
 0x244   : > { %2083 = vmatpush1.bf16.msra.mxu1 %v4919_v26  ;;  %v5003_v26 = vld [vmem:[%s6176_s4 + $0x3c0] ss:$12 sps:$4 sm:$0xff]  }
 0x245   : > { %2084 = vmatprep.subr.bf16.mxu1 %v5180_v16 }
 0x248   : > { %2085 = vmatpush1.bf16.msra.mxu1 %v4923_v27  ;;  %v5008_v27 = vld [vmem:[%s6176_s4 + $0x3ac] ss:$12 sps:$4 sm:$0xff]  }
 0x249   : > { %2100 = vmatprep.subr.bf16.mxu1 %v5180_v16 }
 0x24c   : > { %2101 = vmatpush2.bf16.msra.mxu1 %v4925_v30  ;;  %v5011_v30 = vld [vmem:[%s6176_s4 + $0x394] ss:$12 sps:$4 sm:$0xff]  }
 0x24d   : > { %2504 = vmatprep.subr.bf16.mxu1 %v4932_v32  ;;  %v5014_v32 = vld [vmem:[%s6176_s4 + $0x37c] ss:$12 sps:$4 sm:$0xff]  }
 0x24f   : > { %2103 = vmatmul.mubr.bf16.vlgmr.msra.gmra.mxu1 %v1426_v18  ;;  %v4999_v18 = vld [vmem:[%s6176_s4 + $0x274] ss:$12 sps:$4 sm:$0xff]  }
 0x250   : > { %2505 = vmatpush1.bf16.msra.mxu1 %v4930_v34  ;;  %4184 = vmatprep.mubr.msk.bf16.mxu1 %vm1314_vm3, %v5587_v48  ;;  %v4462_v47 = vpop.f32.mrf.mxu0  ;;  %v4964_v48 = vld [vmem:[#allocation2 + $0x19c] ss:$16 sps:$4 sm:$0xff]   ;;  %v5017_v34 = vld [vmem:[%s6176_s4 + $0x364] ss:$12 sps:$4 sm:$0xff]  }
 0x251   : > { %2506 = vmatprep.subr.bf16.mxu1 %v4938_v35  ;;  %3093 = vmatprep.subr.bf16.mxu0 %v4999_v18  ;;  %v5015_v35 = vld [vmem:[%s6176_s4 + $0x360] ss:$12 sps:$4 sm:$0xff]  }
 0x252   : > { %v4463_v52 = vpop.f32.mrf.mxu0  ;;  %3094 = vmatpush1.bf16.msra.mxu0 %v4997_v19  ;;  %v5042_v18 = vld [vmem:[%s6176_s4 + $0x440] ss:$12 sps:$4 sm:$0xff]   ;;  %v5050_v19 = vld [vmem:[%s6176_s4 + $0x410] ss:$12 sps:$4 sm:$0xff]  }
 0x253   : > { %v5655_v53 = vadd.f32 %v4463_v52, %v4462_v47  ;;  %3095 = vmatprep.subr.bf16.mxu0 %v5002_v20  ;;  %v5021_v47 = vld [vmem:[%s6176_s4 + $0x330] ss:$12 sps:$4 sm:$0xff]   ;;  %v5054_v20 = vld [vmem:[%s6176_s4 + $0x3f8] ss:$12 sps:$4 sm:$0xff]  }
 0x254   : > { %2507 = vmatpush1.bf16.msra.mxu1 %v4936_v36  ;;  %v4465_v56 = vpop.f32.mrf.mxu0  ;;  %v5020_v36 = vld [vmem:[%s6176_s4 + $0x34c] ss:$12 sps:$4 sm:$0xff]   ;;  %v5035_v52 = vld [vmem:[%s6176_s4 + $0x450] ss:$12 sps:$4 sm:$0xff]  }
 0x255   : > { %2508 = vmatprep.subr.bf16.mxu1 %v4944_v37  ;;  %v5027_v37 = vld [vmem:[%s6176_s4 + $0x480] ss:$12 sps:$4 sm:$0xff]   ;;  %v5041_v56 = vld [vmem:[%s6176_s4 + $0x43c] ss:$12 sps:$4 sm:$0xff]  }
 0x256   : > { %v4466_v59 = vpop.f32.mrf.mxu0  ;;  %3096 = vmatpush1.bf16.msra.mxu0 %v5000_v21  ;;  %v5057_v21 = vld [vmem:[%s6176_s4 + $0x3dc] ss:$12 sps:$4 sm:$0xff]  }
 0x257   : > { %3097 = vmatprep.subr.bf16.mxu0 %v5005_v25  ;;  %v5055_v25 = vld [vmem:[%s6176_s4 + $0x3d8] ss:$12 sps:$4 sm:$0xff]  }
 0x258   : > { %2509 = vmatpush1.bf16.msra.mxu1 %v4942_v38  ;;  %v5029_v38 = vld [vmem:[%s6176_s4 + $0x484] ss:$12 sps:$4 sm:$0xff]  }
 0x259   : > { %2510 = vmatprep.subr.bf16.mxu1 %v4950_v39  ;;  %v5744_v39 = vld [vmem:[%s6178_s6 + $0x3] ss:$8 sm:$0xf] }
 0x25a   : > { %3098 = vmatpush2.bf16.msra.mxu0 %v5003_v26  ;;  %v5058_v26 = vld [vmem:[%s6176_s4 + $0x3e0] ss:$12 sps:$4 sm:$0xff]  }
 0x25b   : > { %3099 = vmatprep.subr.bf16.mxu0 %v5008_v27  ;;  %v5061_v27 = vld [vmem:[%s6176_s4 + $0x49c] ss:$12 sps:$4 sm:$0xff]  }
 0x25c   : > { %2511 = vmatpush1.bf16.msra.mxu1 %v4948_v40  ;;  %v5033_v40 = vld [vmem:[%s6176_s4 + $0x46c] ss:$12 sps:$4 sm:$0xff]  }
 0x25d   : > { %2512 = vmatprep.subr.bf16.mxu1 %v4955_v41  ;;  %v5018_v41 = vld [vmem:[%s6176_s4 + $0x348] ss:$12 sps:$4 sm:$0xff]  }
 0x260   : > { %2513 = vmatpush1.bf16.msra.mxu1 %v4953_v42  ;;  %v5023_v42 = vld [vmem:[%s6176_s4 + $0x334] ss:$12 sps:$4 sm:$0xff]  }
 0x261   : > { %2514 = vmatprep.subr.bf16.mxu1 %v4958_v43  ;;  %v5031_v43 = vld [vmem:[%s6176_s4 + $0x468] ss:$12 sps:$4 sm:$0xff]  }
 0x264   : > { %2515 = vmatpush1.bf16.msra.mxu1 %v4956_v44  ;;  %v2175_v44 = vrot.slane %v5744_v39, %v5460_v23 }
 0x265   : > { %2516 = vmatprep.subr.bf16.mxu1 %v4961_v45  ;;  %v5037_v45 = vld [vmem:[%s6176_s4 + $0x454] ss:$12 sps:$4 sm:$0xff]  }
 0x268   : > { %2517 = vmatpush1.bf16.msra.mxu1 %v4959_v46  ;;  %v2179_v46 = vrot.slane %v5744_v39, %v5463_v24 }
 0x269   : > { %2518 = vmatprep.subr.bf16.mxu1 %v4964_v48 }
 0x26c   : > { %2519 = vmatpush1.bf16.msra.mxu1 %v4962_v54 }
 0x26d   : > { %4183 = vmatprep.subr.msk.bf16.mxu1 %vm559_vm0, %v4180_v57 }
 0x270   : > { %2527 = vmatpush2.bf16.msra.mxu1 %v2458_v62 }
 0x271   : > { %2528 = vmatprep.subr.bf16.mxu1 %v4969_v63 }
 0x274   : > { %2529 = vmatpush2.bf16.msra.mxu1 %v4967_v3  ;;  %v5045_v3 = vld [vmem:[%s6176_s4 + $0x424] ss:$12 sps:$4 sm:$0xff]  }
 0x275   : > { %2530 = vmatprep.subr.bf16.mxu1 %v4972_v5 }
 0x278   : > { %2531 = vmatpush2.bf16.msra.mxu1 %v4970_v9  ;;  %v5043_v9 = vld [vmem:[%s6176_s4 + $0x420] ss:$12 sps:$4 sm:$0xff]  }
 0x279   : > { %2532 = vmatprep.subr.bf16.mxu1 %v4975_v10  ;;  %v5049_v10 = vld [vmem:[%s6176_s4 + $0x40c] ss:$12 sps:$4 sm:$0xff]  }
 0x27c   : > { %2533 = vmatpush2.bf16.msra.mxu1 %v4973_v13  ;;  %v5053_v13 = vld [vmem:[%s6176_s4 + $0x3f4] ss:$12 sps:$4 sm:$0xff]  }
 0x27d   : > { %2534 = vmatprep.subr.bf16.mxu1 %v4978_v50  ;;  %v5038_v50 = vld [vmem:[%s6176_s4 + $0x458] ss:$12 sps:$4 sm:$0xff]  }
 0x280   : > { %2535 = vmatpush2.bf16.msra.mxu1 %v4976_v22  ;;  %v5046_v22 = vld [vmem:[%s6176_s4 + $0x428] ss:$12 sps:$4 sm:$0xff]  }
 0x281   : > { %3122 = vmatprep.subr.bf16.mxu1 %v5029_v38 }
 0x283   : > { %2537 = vmatmul.mubr.bf16.vlgmr.msra.gmra.mxu1 %v5589_v49  ;;  %v5006_v49 = vld [vmem:[%s6176_s4 + $0x3a8] ss:$12 sps:$4 sm:$0xff]  }
 0x284   : > { %3100 = vmatpush2.bf16.msra.mxu0 %v5006_v49  ;;  %3123 = vmatpush1.bf16.msra.mxu1 %v5027_v37  ;;  %v2497_v48 = vpop.f32.mrf.mxu0  ;;  %v5059_v49 = vld [vmem:[%s6176_s4 + $0x498] ss:$12 sps:$4 sm:$0xff]  }
 0x285   : > { %3101 = vmatprep.subr.bf16.mxu0 %v5011_v30  ;;  %3124 = vmatprep.subr.bf16.mxu1 %v5033_v40  ;;  %v2498_v54 = vadd.f32 %v2497_v48, %v2175_v44  ;;  %v5062_v30 = vld [vmem:[%s6176_s4 + $0x4a0] ss:$12 sps:$4 sm:$0xff]  }
 0x286   : > { %v2499_v57 = vpop.f32.mrf.mxu0 }
 0x287   : > { %vm2545_vm0 = vcmp.ge.f32.partialorder %v2498_v54, 0.0  ;;  %v2549_v58 = vmul.f32 0.01, %v2498_v54  ;;  %v2500_v59 = vadd.f32 %v2499_v57, %v2179_v46 }
 0x288   : > { %3102 = vmatpush2.bf16.msra.mxu0 %v5009_v31  ;;  %3125 = vmatpush1.bf16.msra.mxu1 %v5031_v43  ;;  %v2501_v62 = vpop.f32.mrf.mxu0  ;;  %v5063_v31 = vld [vmem:[%s6176_s4 + $0x3c8] ss:$12 sps:$4 sm:$0xff]  }
 0x289   : > { %3103 = vmatprep.subr.bf16.mxu0 %v5014_v32  ;;  %3126 = vmatprep.subr.bf16.mxu1 %v5037_v45  ;;  %v2553_v63 = vsel %vm2545_vm0, %v2498_v54, %v2549_v58  ;;  %vm2546_vm3 = vcmp.ge.f32.partialorder %v2500_v59, 0.0  ;;  %v2550_v2 = vmul.f32 0.01, %v2500_v59  ;;  %v3959_v32 = vld [vmem:[%s6178_s6 + $0x2] ss:$8 sm:$0x7] }
 0x28a   : > { %v2502_v4 = vpop.f32.mrf.mxu0  ;;  %v5786_v5 = vpack.c.bf16 %v2553_v63, %v2553_v63  ;;  %v1540_v43 = vrot.slane %v3959_v32, %v5604_v0 }
 0x28b   : > { %v2554_v6 = vsel %vm2546_vm3, %v2500_v59, %v2550_v2  ;;  %v5064_v2 = vld [vmem:[%s6176_s4 + $0x308] ss:$12 sps:$4 sm:$0xff]  }
 0x28c   : > { %3104 = vmatpush2.bf16.msra.mxu0 %v5012_v33  ;;  %3127 = vmatpush1.bf16.msra.mxu1 %v5035_v52  ;;  %v5788_v7 = vpack.c.bf16 %v2554_v6, %v2554_v6  ;;  %v2065_v44 = vadd.f32 %v5655_v53, %v1540_v43  ;;  %v5068_v4 = vld [vmem:[%s6177_s5 + $0xf0] sm:$0xff]   ;;  %v5069_v6 = vld [vmem:[%s6176_s4 + $0x398] ss:$12 sps:$4 sm:$0xff]   ;;  %v5091_v43 = vld [vmem:[%s6177_s5 + $0xa8] sm:$0xff]  }
 0x28d   : > { %3105 = vmatprep.subr.bf16.mxu0 %v5017_v34  ;;  %3128 = vmatprep.subr.bf16.mxu1 %v5041_v56  ;;  %v1536_v34 = vrot.slane %v3959_v32, %v5463_v24 }
 0x28e   : > { %3113 = vmatprep.mubr.bf16.mxu0 %v5788_v7 }
 0x290   : > { %3106 = vmatpush2.bf16.msra.mxu0 %v5015_v35  ;;  %3129 = vmatpush1.bf16.msra.mxu1 %v5039_v61 }
 0x291   : > { %3107 = vmatprep.subr.bf16.mxu0 %v5020_v36  ;;  %3130 = vmatprep.subr.bf16.mxu1 %v5045_v3  ;;  %v1985_v36 = vadd.f32 %v5647_v29, %v1536_v34  ;;  %v2183_v29 = vrot.slane %v5744_v39, %v5604_v0  ;;  %v5067_v3 = vld [vmem:[%s6176_s4 + $0x2f0] ss:$12 sps:$4 sm:$0xff]  }
 0x292   : > { %v5088_v34 = vld [vmem:[%s6177_s5 + $0x78] sm:$0xff]  }
 0x294   : > { %3108 = vmatpush2.bf16.msra.mxu0 %v5018_v41  ;;  %3131 = vmatpush1.bf16.msra.mxu1 %v5043_v9  ;;  %v5072_v9 = vld [vmem:[%s6176_s4 + $0x380] ss:$12 sps:$4 sm:$0xff]  }
 0x295   : > { %3109 = vmatprep.subr.bf16.mxu0 %v5023_v42  ;;  %3132 = vmatprep.subr.bf16.mxu1 %v5049_v10  ;;  %v5073_v10 = vld [vmem:[%s6176_s4 + $0x2c0] ss:$12 sps:$4 sm:$0xff]  }
 0x298   : > { %3110 = vmatpush2.bf16.msra.mxu0 %v5021_v47  ;;  %3133 = vmatpush1.bf16.msra.mxu1 %v5047_v12  ;;  %v5075_v12 = vld [vmem:[%s6176_s4 + $0x368] ss:$12 sps:$4 sm:$0xff]  }
 0x299   : > { %3111 = vmatprep.subr.bf16.mxu0 %v5026_v55  ;;  %3134 = vmatprep.subr.bf16.mxu1 %v5053_v13  ;;  %v2187_v55 = vrot.slane %v5744_v39, %v1052_v1  ;;  %v5066_v39 = vld [vmem:[%s6176_s4 + $0x3b0] ss:$12 sps:$4 sm:$0xff]   ;;  %v5076_v13 = vld [vmem:[%s6176_s4 + $0x2a8] ss:$12 sps:$4 sm:$0xff]  }
 0x29c   : > { %3112 = vmatpush2.bf16.msra.mxu0 %v5024_v51  ;;  %3135 = vmatpush1.bf16.msra.mxu1 %v5051_v14  ;;  %v5078_v14 = vld [vmem:[%s6176_s4 + $0x350] ss:$12 sps:$4 sm:$0xff]  }
 0x29d   : > { %3203 = vmatprep.subr.bf16.mxu0 %v5180_v16  ;;  %3136 = vmatprep.subr.bf16.mxu1 %v5057_v21  ;;  %v5083_v21 = vld [vmem:[%s6177_s5 + $0xc8] sm:$0xff]  }
 0x29f   : > { %3114 = vmatmul.mubr.bf16.vlgmr.msra.gmra.mxu0 %v5786_v5 }
 0x2a0   : > { %3204 = vmatpush1.bf16.msra.mxu0 %v5030_v8  ;;  %3137 = vmatpush1.bf16.msra.mxu1 %v5055_v25  ;;  %v5070_v8 = vld [vmem:[%s6176_s4 + $0x2d8] ss:$12 sps:$4 sm:$0xff]   ;;  %v5084_v25 = vld [vmem:[%s6176_s4 + $0x320] ss:$12 sps:$4 sm:$0xff]  }
 0x2a1   : > { %3205 = vmatprep.subr.bf16.mxu0 %v5180_v16  ;;  %3152 = vmatprep.subr.bf16.mxu1 %v5061_v27 }
 0x2a4   : > { %3206 = vmatpush1.bf16.msra.mxu0 %v5034_v11  ;;  %3153 = vmatpush2.bf16.msra.mxu1 %v5059_v49  ;;  %v5074_v11 = vld [vmem:[%s6177_s5 + $0xe0] sm:$0xff]  }
 0x2a5   : > { %3207 = vmatprep.subr.bf16.mxu0 %v5180_v16  ;;  %4468 = vmatprep.subr.bf16.mxu1 %v5063_v31  ;;  %v5085_v49 = vld [vmem:[%s6176_s4 + $0x260] ss:$12 sps:$4 sm:$0xff]   ;;  %v5087_v31 = vld [vmem:[%s6177_s5 + $0xb8] sm:$0xff]  }
 0x2a8   : > { %3208 = vmatpush1.bf16.msra.mxu0 %v5038_v50  ;;  %v5077_v50 = vld [vmem:[%s6177_s5 + $0xd8] sm:$0xff]  }
 0x2a9   : > { %3209 = vmatprep.subr.bf16.mxu0 %v5180_v16 }
 0x2ac   : > { %3210 = vmatpush1.bf16.msra.mxu0 %v5042_v18  ;;  %v5079_v18 = vld [vmem:[%s6176_s4 + $0x290] ss:$12 sps:$4 sm:$0xff]  }
 0x2ad   : > { %3211 = vmatprep.subr.bf16.mxu0 %v5180_v16 }
 0x2b0   : > { %3212 = vmatpush1.bf16.msra.mxu0 %v5046_v22  ;;  %v5080_v22 = vld [vmem:[%s6177_s5 + $0xd0] sm:$0xff]  }
 0x2b1   : > { %3213 = vmatprep.subr.bf16.mxu0 %v5180_v16 }
 0x2b4   : > { %3214 = vmatpush1.bf16.msra.mxu0 %v5050_v19  ;;  %v5081_v19 = vld [vmem:[%s6176_s4 + $0x338] ss:$12 sps:$4 sm:$0xff]  }
 0x2b5   : > { %3215 = vmatprep.subr.bf16.mxu0 %v5180_v16 }
 0x2b8   : > { %3216 = vmatpush1.bf16.msra.mxu0 %v5054_v20  ;;  %v5082_v20 = vld [vmem:[%s6176_s4 + $0x278] ss:$12 sps:$4 sm:$0xff]  }
 0x2b9   : > { %3217 = vmatprep.subr.bf16.mxu0 %v5180_v16 }
 0x2bc   : > { %3218 = vmatpush1.bf16.msra.mxu0 %v5058_v26 }
 0x2bd   : > { %3233 = vmatprep.subr.bf16.mxu0 %v5180_v16  ;;  %v1532_v16 = vrot.slane %v3959_v32, %v5460_v23 }
 0x2bf   : > { %v1983_v33 = vadd.f32 %v5644_v28, %v1532_v16 }
 0x2c0   : > { %3234 = vmatpush2.bf16.msra.mxu0 %v5062_v30  ;;  %v5086_v30 = vld [vmem:[%s6177_s5 + $0xc0] sm:$0xff]  }
 0x2c1   : > { %4612 = vmatprep.subr.bf16.mxu0 %v5178_v15 }
 0x2eb   : > { %v2023_v35 = vpop.f32.mrf.mxu1 }
 0x2ec   : > { %v5866_v37 = vadd.f32 %v2023_v35, %v1983_v33 }
 0x2ed   : > { %v2025_v38 = vpop.f32.mrf.mxu1 }
 0x2ee   : > { %v5868_v40 = vadd.f32 %v2025_v38, %v1985_v36  ;;  %v5089_v36 = vld [vmem:[%s6177_s5 + $0xb0] sm:$0xff]   ;;  %vm2110_vm12 = vcmp.ge.f32.partialorder %v5866_v37, 0.0 }
 0x2ef   : > { %v2027_v41 = vpop.f32.mrf.mxu1 }
 0x2f0   : > { %v2114_v27 = vmul.f32 0.01, %v5868_v40  ;;  %vm2111_vm11 = vcmp.ge.f32.partialorder %v5868_v40, 0.0 }
 0x2f1   : > { %v2028_v42 = vpop.f32.mrf.mxu1 }
 0x2f2   : > { %v2117_v16 = vsel %vm2111_vm11, %v5868_v40, %v2114_v27  ;;  %v5090_v42 = vld [vmem:[%s6177_s5 + $0x70] sm:$0xff]  }
 0x2f3   : > { %v3253_v41 = vpack.c.bf16 %v2117_v16, %v2117_v16 }
 0x30f   : > { %v2104_v45 = vpop.f32.mrf.mxu1 }
 0x310   : > { %v5872_v46 = vadd.f32 %v2104_v45, %v2065_v44  ;;  %v5093_v45 = vld [vmem:[%s6177_s5 + $0xa0] sm:$0xff]  }
 0x311   : > { %v2106_v28 = vpop.f32.mrf.mxu1 }
 0x312   : > { %v2115_v26 = vmul.f32 0.01, %v5872_v46  ;;  %vm2112_vm10 = vcmp.ge.f32.partialorder %v5872_v46, 0.0  ;;  %v5095_v28 = vld [vmem:[%s6177_s5 + $0x98] sm:$0xff]  }
 0x313   : > { %v2107_v47 = vpop.f32.mrf.mxu1 }
 0x314   : > { %v2118_v32 = vsel %vm2112_vm10, %v5872_v46, %v2115_v26  ;;  %v5094_v46 = vld [vmem:[%s6177_s5 + $0x60] sm:$0xff]   ;;  %v5096_v47 = vld [vmem:[%s6177_s5 + $0x58] sm:$0xff]  }
 0x315   : > { %v2108_v48 = vpop.f32.mrf.mxu1  ;;  %v3254_v35 = vpack.c.bf16 %v2118_v32, %v2118_v32 }
 0x316   : > { %v5097_v48 = vld [vmem:[%s6177_s5 + $0x90] sm:$0xff]  }
 0x343   : > { %v2538_v52 = vpop.f32.mrf.mxu1 }
 0x344   : > { %v2539_v54 = vadd.f32 %v2538_v52, %v2183_v29  ;;  %v5098_v29 = vld [vmem:[%s6177_s5 + $0x50] sm:$0xff]   ;;  %v5100_v52 = vld [vmem:[%s6177_s5 + $0x48] sm:$0xff]  }
 0x345   : > { %v2540_v56 = vpop.f32.mrf.mxu1 }
 0x346   : > { %vm2547_vm8 = vcmp.ge.f32.partialorder %v2539_v54, 0.0  ;;  %v2551_v57 = vmul.f32 0.01, %v2539_v54  ;;  %v2541_v58 = vadd.f32 %v2540_v56, %v2187_v55  ;;  %v5099_v55 = vld [vmem:[%s6177_s5 + $0x88] sm:$0xff]   ;;  %v2113_v56 = vmul.f32 0.01, %v5866_v37 }
 0x347   : > { %v2542_v53 = vpop.f32.mrf.mxu1 }
 0x348   : > { %vm2548_vm9 = vcmp.ge.f32.partialorder %v2541_v58, 0.0  ;;  %v2552_v59 = vmul.f32 0.01, %v2541_v58  ;;  %v2555_v51 = vsel %vm2547_vm8, %v2539_v54, %v2551_v57  ;;  %v5101_v54 = vld [vmem:[%s6177_s5 + $0x80] sm:$0xff]   ;;  %v2116_v53 = vsel %vm2110_vm12, %v5866_v37, %v2113_v56  ;;  %v5107_v37 = vld [vmem:[%s6177_s5 + $0x198] sm:$0xff]  }
 0x349   : > { %v2543_v61 = vpop.f32.mrf.mxu1  ;;  %v2559_v1 = vpack.c.bf16 %v2555_v51, %v2555_v51  ;;  %v5102_v57 = vld [vmem:[%s6177_s5 + $0x40] sm:$0xff]   ;;  %v3252_v51 = vpack.c.bf16 %v2116_v53, %v2116_v53 }
 0x34a   : > { %v2556_v62 = vsel %vm2548_vm9, %v2541_v58, %v2552_v59  ;;  %v5103_v58 = vld [vmem:[%s6177_s5 + $0x1a8] sm:$0xff]   ;;  %v5105_v61 = vld [vmem:[%s6177_s5 + $0x1a0] sm:$0xff]  }
 0x34b   : > { %v2560_v63 = vpack.c.bf16 %v2556_v62, %v2556_v62  ;;  %v5104_v59 = vld [vmem:[%s6177_s5 + $0x168] sm:$0xff]   ;;  %v5106_v62 = vld [vmem:[%s6177_s5 + $0x160] sm:$0xff]  }
 0x34d   : > { %4360 = vmatprep.mubr.msk.bf16.mxu1 %vm1944_vm7, %v2560_v63  ;;  %4361 = vmatprep.mubr.msk.bf16.mxu0 %vm1944_vm7, %v2560_v63  ;;  %v5108_v63 = vld [vmem:[%s6177_s5 + $0x158] sm:$0xff]  }
 0x34e   : > { %3155 = vmatmul.mubr.bf16.vlgmr.msra.gmra.mxu1 %v2559_v1  ;;  %3236 = vmatmul.mubr.bf16.vlgmr.msra.gmra.mxu0 %v2559_v1  ;;  %v5111_v1 = vld [vmem:[%s6177_s5 + $0x188] sm:$0xff]  }
 0x34f   : > { %4469 = vmatpush3.bf16.msra.mxu1 %v5064_v2  ;;  %4613 = vmatpush3.bf16.msra.mxu0 %v5065_v17  ;;  %v5109_v2 = vld [vmem:[%s6177_s5 + $0x190] sm:$0xff]  }
 0x350   : > { %3195 = vmatprep.mubr.bf16.mxu1 %v5788_v7  ;;  %4470 = vmatprep.subr.bf16.mxu1 %v5066_v39  ;;  %v5071_v7 = vld [vmem:[%s6177_s5 + $0xe8] sm:$0xff]   ;;  %v5110_v17 = vld [vmem:[%s6177_s5 + $0x150] sm:$0xff]  }
 0x351   : > { %4614 = vmatprep.subr.bf16.mxu0 %v5178_v15  ;;  %4628 = vmatprep.mubr.msk.bf16.mxu0 %vm5179_vm2, %v5178_v15  ;;  %v5120_v39 = vld [vmem:[%s6177_s5 + $0x1e8] sm:$0xff]  }
 0x353   : > { %4471 = vmatpush3.bf16.msra.mxu1 %v5067_v3  ;;  %4615 = vmatpush3.bf16.msra.mxu0 %v5068_v4  ;;  %v5112_v3 = vld [vmem:[%s6177_s5 + $0x148] sm:$0xff]   ;;  %v5113_v4 = vld [vmem:[%s6177_s5 + $0x180] sm:$0xff]  }
 0x354   : > { %4472 = vmatprep.subr.bf16.mxu1 %v5069_v6  ;;  %4616 = vmatprep.subr.bf16.mxu0 %v5178_v15  ;;  %v5122_v6 = vld [vmem:[%s6177_s5 + $0x1e0] sm:$0xff]  }
 0x357   : > { %4473 = vmatpush3.bf16.msra.mxu1 %v5070_v8  ;;  %4617 = vmatpush3.bf16.msra.mxu0 %v5071_v7  ;;  %v5114_v8 = vld [vmem:[%s6177_s5 + $0x140] sm:$0xff]   ;;  %v5115_v7 = vld [vmem:[%s6177_s5 + $0x178] sm:$0xff]  }
 0x358   : > { %4474 = vmatprep.subr.bf16.mxu1 %v5072_v9  ;;  %4618 = vmatprep.subr.bf16.mxu0 %v5178_v15  ;;  %v5123_v9 = vld [vmem:[%s6177_s5 + $0x1d8] sm:$0xff]  }
 0x35b   : > { %4475 = vmatpush3.bf16.msra.mxu1 %v5073_v10  ;;  %4619 = vmatpush3.bf16.msra.mxu0 %v5074_v11  ;;  %v5116_v10 = vld [vmem:[%s6177_s5 + $0x138] sm:$0xff]   ;;  %v5117_v11 = vld [vmem:[%s6177_s5 + $0x170] sm:$0xff]  }
 0x35c   : > { %4476 = vmatprep.subr.bf16.mxu1 %v5075_v12  ;;  %4620 = vmatprep.subr.bf16.mxu0 %v5178_v15  ;;  %v5124_v12 = vld [vmem:[%s6177_s5 + $0x1d0] sm:$0xff]  }
 0x35f   : > { %4477 = vmatpush3.bf16.msra.mxu1 %v5076_v13  ;;  %4621 = vmatpush3.bf16.msra.mxu0 %v5077_v50  ;;  %v5969_v33 = vpop.f32.mrf.mxu0  ;;  %v5118_v13 = vld [vmem:[%s6177_s5 + $0x130] sm:$0xff]   ;;  %v5125_v50 = vld [vmem:[%s6177_s5 + $0x1c8] sm:$0xff]  }
 0x360   : > { %4478 = vmatprep.subr.bf16.mxu1 %v5078_v14  ;;  %4622 = vmatprep.subr.bf16.mxu0 %v5178_v15  ;;  %v5126_v14 = vld [vmem:[%s6177_s5 + $0x1c0] sm:$0xff]  }
 0x361   : > { %v5977_v38 = vpop.f32.mrf.mxu0 }
 0x363   : > { %4479 = vmatpush3.bf16.msra.mxu1 %v5079_v18  ;;  %4623 = vmatpush3.bf16.msra.mxu0 %v5080_v22  ;;  %v3119_v40 = vpop.f32.mrf.mxu0  ;;  %v5127_v18 = vld [vmem:[%s6177_s5 + $0x1b8] sm:$0xff]   ;;  %v5128_v22 = vld [vmem:[%s6177_s5 + $0x1b0] sm:$0xff]  }
 0x364   : > { %4480 = vmatprep.subr.bf16.mxu1 %v5081_v19  ;;  %4624 = vmatprep.subr.bf16.mxu0 %v5178_v15  ;;  %v3961_v19 = vld [vmem:[%s6178_s6 + $0x4] ss:$8 sm:$0x7] }
 0x365   : > { %v3120_v44 = vpop.f32.mrf.mxu0 }
 0x367   : > { %4481 = vmatpush3.bf16.msra.mxu1 %v5082_v20  ;;  %4625 = vmatpush3.bf16.msra.mxu0 %v5083_v21  ;;  %v2666_v20 = vrot.slane %v3961_v19, %v5460_v23  ;;  %v2670_v21 = vrot.slane %v3961_v19, %v5463_v24  ;;  %v5119_v23 = vld [vmem:[%s6174_s2 + $0x20] ss:$0 sps:$4 sm:$0x77]  }
 0x368   : > { %4482 = vmatprep.subr.bf16.mxu1 %v5084_v25  ;;  %4626 = vmatprep.subr.bf16.mxu0 %v5178_v15  ;;  %v3724_v44 = vsel %vm3722_vm1, %v5119_v23, 0 }
 0x369   : > { %v3116_v25 = vadd.f32 %v5969_v33, %v2666_v20 }
 0x36b   : > { %4483 = vmatpush3.bf16.msra.mxu1 %v5085_v49  ;;  %4627 = vmatpush3.bf16.msra.mxu0 %v5086_v30  ;;  %v3118_v49 = vadd.f32 %v5977_v38, %v2670_v21 }
 0x36c   : > { %4490 = vmatprep.subr.bf16.mxu1 %v5087_v31  ;;  %4632 = vmatprep.subr.bf16.mxu0 %v5178_v15 }
 0x36e   : > { %3196 = vmatmul.mubr.bf16.vlgmr.msra.gmra.mxu1 %v5786_v5  ;;  %4629 = vmatmul.mubr.bf16.vlgmr.msra.gmra.mxu0 %v3254_v35  ;;  %v5092_v5 = vld [vmem:[%s6177_s5 + $0x68] sm:$0xff]  }
 0x36f   : > { %4491 = vmatpush3.bf16.msra.mxu1 %v5088_v34  ;;  %3431 = vmatprep.mubr.bf16.mxu1 %v3253_v41 }
 0x370   : > { %4492 = vmatprep.subr.bf16.mxu1 %v5089_v36  ;;  %4648 = vmatprep.mubr.msk.bf16.mxu0 %vm5179_vm2, %v5178_v15 }
 0x371   : > { %4633 = vmatpush3.bf16.msra.mxu0 %v5120_v39 }
 0x372   : > { %4634 = vmatprep.subr.bf16.mxu0 %v5178_v15 }
 0x373   : > { %4493 = vmatpush3.bf16.msra.mxu1 %v5090_v42 }
 0x374   : > { %4494 = vmatprep.subr.bf16.mxu1 %v5091_v43 }
 0x375   : > { %4635 = vmatpush3.bf16.msra.mxu0 %v5122_v6  ;;  %v5132_v6 = vld [vmem:[%s6177_s5 + $0x110] sm:$0xff]  }
 0x376   : > { %4636 = vmatprep.subr.bf16.mxu0 %v5178_v15 }
 0x377   : > { %4495 = vmatpush3.bf16.msra.mxu1 %v5092_v5  ;;  %v5121_v5 = vld [vmem:[%s6174_s2 + $0x18] sm:$0xff]  }
 0x378   : > { %4496 = vmatprep.subr.bf16.mxu1 %v5093_v45  ;;  %v3708_v45 = vld [vmem:[%s5317_s20 + $0x10] sm:$0xf] }
 0x379   : > { %4637 = vmatpush3.bf16.msra.mxu0 %v5123_v9 }
 0x37a   : > { %4638 = vmatprep.subr.bf16.mxu0 %v5178_v15 }
 0x37b   : > { %4497 = vmatpush3.bf16.msra.mxu1 %v5094_v46  ;;  %v5129_v46 = vld [vmem:[%s6177_s5 + $0x128] sm:$0xff]  }
 0x37c   : > { %4498 = vmatprep.subr.bf16.mxu1 %v5095_v28  ;;  %v5130_v28 = vld [vmem:[%s6177_s5 + $0x120] sm:$0xff]  }
 0x37d   : > { %4639 = vmatpush3.bf16.msra.mxu0 %v5124_v12 }
 0x37e   : > { %4640 = vmatprep.subr.bf16.mxu0 %v5178_v15 }
 0x37f   : > { %4499 = vmatpush3.bf16.msra.mxu1 %v5096_v47 }
 0x380   : > { %4500 = vmatprep.subr.bf16.mxu1 %v5097_v48 }
 0x381   : > { %4641 = vmatpush3.bf16.msra.mxu0 %v5125_v50 }
 0x382   : > { %4642 = vmatprep.subr.bf16.mxu0 %v5178_v15 }
 0x383   : > { %4501 = vmatpush3.bf16.msra.mxu1 %v5098_v29  ;;  %v2674_v29 = vrot.slane %v3961_v19, %v5604_v0 }
 0x384   : > { %4502 = vmatprep.subr.bf16.mxu1 %v5099_v55 }
 0x385   : > { %4643 = vmatpush3.bf16.msra.mxu0 %v5126_v14 }
 0x386   : > { %4644 = vmatprep.subr.bf16.mxu0 %v5178_v15 }
 0x387   : > { %4503 = vmatpush3.bf16.msra.mxu1 %v5100_v52 }
 0x388   : > { %4504 = vmatprep.subr.bf16.mxu1 %v5101_v54 }
 0x389   : > { %4645 = vmatpush3.bf16.msra.mxu0 %v5127_v18 }
 0x38a   : > { %4646 = vmatprep.subr.bf16.mxu0 %v5178_v15 }
 0x38b   : > { %4505 = vmatpush3.bf16.msra.mxu1 %v5102_v57 }
 0x38c   : > { %4521 = vmatprep.subr.bf16.mxu1 %v5103_v58 }
 0x38d   : > { %4647 = vmatpush3.bf16.msra.mxu0 %v5128_v22 }
 0x38e   : > { %3432 = vmatmul.mubr.bf16.vlgmr.msra.gmra.mxu1 %v3252_v51 }
 0x38f   : > { %4522 = vmatpush3.bf16.msra.mxu1 %v5104_v59 }
 0x390   : > { %4523 = vmatprep.subr.bf16.mxu1 %v5105_v61 }
 0x393   : > { %4524 = vmatpush3.bf16.msra.mxu1 %v5106_v62 }
 0x394   : > { %4525 = vmatprep.subr.bf16.mxu1 %v5107_v37 }
 0x397   : > { %4526 = vmatpush3.bf16.msra.mxu1 %v5108_v63 }
 0x398   : > { %4527 = vmatprep.subr.bf16.mxu1 %v5109_v2 }
 0x39b   : > { %4528 = vmatpush3.bf16.msra.mxu1 %v5110_v17 }
 0x39c   : > { %4529 = vmatprep.subr.bf16.mxu1 %v5111_v1 }
 0x39f   : > { %4530 = vmatpush3.bf16.msra.mxu1 %v5112_v3 }
 0x3a0   : > { %4531 = vmatprep.subr.bf16.mxu1 %v5113_v4  ;;  %v5131_v4 = vld [vmem:[%s6177_s5 + $0x118] sm:$0xff]  }
 0x3a3   : > { %4532 = vmatpush3.bf16.msra.mxu1 %v5114_v8  ;;  %v5133_v8 = vld [vmem:[%s6177_s5 + $0x108] sm:$0xff]  }
 0x3a4   : > { %4533 = vmatprep.subr.bf16.mxu1 %v5115_v7 }
 0x3a7   : > { %4534 = vmatpush3.bf16.msra.mxu1 %v5116_v10 }
 0x3a8   : > { %4535 = vmatprep.subr.bf16.mxu1 %v5117_v11 }
 0x3ab   : > { %4536 = vmatpush3.bf16.msra.mxu1 %v5118_v13  ;;  %v327_v13 = vld [vmem:[%s6178_s6 + $0x5] ss:$0 sm:$0xff] }
 0x3ac   : > { %4652 = vmatprep.subr.bf16.mxu1 %v5178_v15 }
 0x40e   : > { %v3156_v26 = vpop.f32.mrf.mxu1  ;;  %v3237_v27 = vpop.f32.mrf.mxu0 }
 0x40f   : > { %v3157_v30 = vadd.f32 %v3156_v26, %v3116_v25 }
 0x410   : > { %v3158_v31 = vpop.f32.mrf.mxu1  ;;  %v3239_v32 = vpop.f32.mrf.mxu0 }
 0x411   : > { %vm3243_vm13 = vcmp.ge.f32.partialorder %v3157_v30, 0.0  ;;  %v3246_v16 = vmul.f32 0.01, %v3157_v30  ;;  %v3159_v34 = vadd.f32 %v3158_v31, %v3118_v49 }
 0x412   : > { %v3160_v35 = vpop.f32.mrf.mxu1  ;;  %v3240_v36 = vpop.f32.mrf.mxu0 }
 0x413   : > { %vm3244_vm14 = vcmp.ge.f32.partialorder %v3159_v34, 0.0  ;;  %v3247_v41 = vmul.f32 0.01, %v3159_v34  ;;  %v3249_v24 = vsel %vm3243_vm13, %v3157_v30, %v3246_v16  ;;  %v328_v16 = vld [vmem:[%s6178_s6 + $0x6] ss:$0 sm:$0xff] }
 0x414   : > { %v3161_v33 = vpop.f32.mrf.mxu1  ;;  %v3241_v40 = vpop.f32.mrf.mxu0  ;;  %v3480_v43 = vpack.c.bf16 %v3249_v24, %v3249_v24 }
 0x415   : > { %v3250_v38 = vsel %vm3244_vm14, %v3159_v34, %v3247_v41 }
 0x416   : > { %v3481_v42 = vpack.c.bf16 %v3250_v38, %v3250_v38 }
 0x418   : > { %3659 = vmatprep.mubr.bf16.mxu1 %v3481_v42 }
 0x419   : > { %3660 = vmatmul.mubr.bf16.vlgmr.msra.gmra.mxu1 %v3480_v43 }
 0x41a   : > { %4653 = vmatpush3.bf16.msra.mxu1 %v3724_v44  ;;  %4656 = vmatprep.mubr.msk.bf16.mxu1 %vm5179_vm2, %v5178_v15 }
 0x41b   : > { %4654 = vmatprep.subr.bf16.mxu1 %v5178_v15 }
 0x41e   : > { %4655 = vmatpush3.bf16.msra.mxu1 %v5121_v5 }
 0x41f   : > { %4660 = vmatprep.subr.bf16.mxu1 %v5178_v15 }
 0x421   : > { %4657 = vmatmul.mubr.msk.bf16.vlgmr.msra.gmra.mxu1 %vm3718_vm4, %v3708_v45 }
 0x422   : > { %4661 = vmatpush3.bf16.msra.mxu1 %v5129_v46  ;;  %4672 = vmatprep.mubr.msk.bf16.mxu1 %vm5179_vm2, %v5178_v15 }
 0x423   : > { %4662 = vmatprep.subr.bf16.mxu1 %v5178_v15 }
 0x426   : > { %4663 = vmatpush3.bf16.msra.mxu1 %v5130_v28  ;;  %v329_v28 = vld [vmem:[%s6178_s6 + $0x7] ss:$0 sm:$0xff] }
 0x427   : > { %4664 = vmatprep.subr.bf16.mxu1 %v5178_v15 }
 0x42a   : > { %4665 = vmatpush3.bf16.msra.mxu1 %v5131_v4 }
 0x42b   : > { %4666 = vmatprep.subr.bf16.mxu1 %v5178_v15 }
 0x42e   : > { %v4484_v47 = vpop.f32.mrf.mxu1  ;;  %v3473_v48 = vpop.f32.mrf.mxu0  ;;  %4667 = vmatpush3.bf16.msra.mxu1 %v5132_v6 }
 0x42f   : > { %4668 = vmatprep.subr.bf16.mxu1 %v5178_v15 }
 0x430   : > { %v4485_v55 = vpop.f32.mrf.mxu1  ;;  %v4630_v52 = vpop.f32.mrf.mxu0 }
 0x431   : > { %v4486_v54 = vadd.f32 %v4485_v55, %v4484_v47 }
 0x432   : > { %v4487_v56 = vpop.f32.mrf.mxu1  ;;  %v3476_v57 = vpop.f32.mrf.mxu0  ;;  %4669 = vmatpush3.bf16.msra.mxu1 %v5133_v8 }
 0x433   : > { %v3198_v58 = vadd.f32 %v4486_v54, %v2674_v29  ;;  %4670 = vmatprep.subr.bf16.mxu1 %v5178_v15 }
 0x434   : > { %v4488_v53 = vpop.f32.mrf.mxu1  ;;  %v4631_v59 = vpop.f32.mrf.mxu0 }
 0x435   : > { %v3238_v51 = vadd.f32 %v3237_v27, %v3198_v58 }
 0x437   : > { %vm3245_vm5 = vcmp.ge.f32.partialorder %v3238_v51, 0.0  ;;  %v3248_v61 = vmul.f32 0.01, %v3238_v51 }
 0x439   : > { %v3251_v62 = vsel %vm3245_vm5, %v3238_v51, %v3248_v61 }
 0x43a   : > { %v3482_v37 = vpack.c.bf16 %v3251_v62, %v3251_v62 }
 0x43c   : > { %4649 = vmatmul.mubr.bf16.vlgmr.msra.gmra.mxu0 %v3482_v37 }
 0x44e   : > { %v4506_v63 = vpop.f32.mrf.mxu1 }
 0x450   : > { %v4507_v2 = vpop.f32.mrf.mxu1 }
 0x451   : > { %v4508_v17 = vadd.f32 %v4507_v2, %v4506_v63 }
 0x452   : > { %v4509_v1 = vpop.f32.mrf.mxu1 }
 0x453   : > { %v3474_v39 = vadd.f32 %v4508_v17, %v3473_v48  ;;  %v330_v48 = vld [vmem:[%s6178_s6 + $0x20] ss:$0 sm:$0xff] }
 0x454   : > { %v4510_v0 = vpop.f32.mrf.mxu1 }
 0x455   : > { %v3479_v3 = vadd.f32 %v3474_v39, %v5595_v60  ;;  %v5134_v60 = vld [vmem:[%s6177_s5 + $0x100] sm:$0xff]  }
 0x456   : > { %4671 = vmatpush3.bf16.msra.mxu1 %v5134_v60 }
 0x4d9   : > { %v4537_v7 = vpop.f32.mrf.mxu1 }
 0x4db   : > { %v4538_v9 = vpop.f32.mrf.mxu1 }
 0x4dc   : > { %v4539_v10 = vadd.f32 %v4538_v9, %v4537_v7 }
 0x4dd   : > { %v4540_v11 = vpop.f32.mrf.mxu1 }
 0x4df   : > { %v4541_v12 = vpop.f32.mrf.mxu1 }
 0x4e1   : > { %v3760_v50 = vpop.f32.mrf.mxu1 }
 0x4e2   : > { %v3761_v14 = vadd.f32 %v3760_v50, %v327_v13 }
 0x4e3   : > { %v4658_v18 = vpop.f32.mrf.mxu1 }
 0x4e4   : > { %vm3766_vm2 = vcmp.ge.f32.partialorder %v3761_v14, 0.0  ;;  %v3767_v22 = vmul.f32 0.01, %v3761_v14 }
 0x4e5   : > { %v3763_v15 = vpop.f32.mrf.mxu1 }
 0x4e6   : > { %v3768_v19 = vsel %vm3766_vm2, %v3761_v14, %v3767_v22 }
 0x4e7   : > { %v3769_v20 = vpack.c.bf16 %v3768_v19, %v3768_v19  ;;  %v4659_v21 = vpop.f32.mrf.mxu1 }
 0x4e9   : > { %4673 = vmatmul.mubr.msk.bf16.vlgmr.msra.gmra.mxu1 %vm3806_vm6, %v3769_v20 }
 0x4fc   : > { %v3701_v25 = vpop.f32.mrf.mxu0 }
 0x4fd   : > { %v3702_v26 = vadd.f32 %v4539_v10, %v3701_v25 }
 0x4fe   : > { %v4650_v27 = vpop.f32.mrf.mxu0 }
 0x4ff   : > { %v3707_v49 = vadd.f32 %v3702_v26, %v3479_v3 }
 0x500   : > { %v3704_v30 = vpop.f32.mrf.mxu0 }
 0x502   : > { %v4651_v31 = vpop.f32.mrf.mxu0 }
 0x5a9   : > { %v3844_v32 = vpop.f32.mrf.mxu1 }
 0x5aa   : > { %v3850_v34 = vadd.f32 %v3844_v32, %v3707_v49 }
 0x5ab   : > { %v4674_v35 = vpop.f32.mrf.mxu1 }
 0x5ac   : > { %v3851_v36 = vadd.f32 %v3850_v34, %v328_v16 }
 0x5ad   : > { %v3847_v41 = vpop.f32.mrf.mxu1 }
 0x5ae   : > { %v3852_v23 = vsel %vm936_vm15, %v3851_v36, 0.0 }
 0x5af   : > { %v4675_v24 = vpop.f32.mrf.mxu1  ;;  %3853 = vadd.xlane.f32.xlu0 %v3852_v23 }
 0x638   : > { %v3854_v33 = vpop.xlane.xlu0 %3853 }
 0x639   : > { %v3856_v40 = vmul.f32 0.03125, %v3854_v33 }
 0x63b   : > { %v3857_v38 = vsub.f32 %v3851_v36, %v3856_v40 }
 0x63d   : > { %v3858_v42 = vmul.f32 %v3857_v38, %v3857_v38 }
 0x63f   : > { %v3859_v43 = vsel %vm936_vm15, %v3858_v42, 0.0 }
 0x640   : > { %3860 = vadd.xlane.f32.xlu0 %v3859_v43 }
 0x6c9   : > { %v3861_v44 = vpop.xlane.xlu0 %3860 }
 0x6ca   : > { %v3862_v5 = vmul.f32 0.03125, %v3861_v44 }
 0x6cc   : > { %v3863_v45 = vadd.f32 1e-05, %v3862_v5 }
 0x6ce   : > { %5135 = vrsqrt.f32 %v3863_v45 }
 0x6db   : > { %v5136_v46 = vpop.eup %5135 }
 0x6dc   : > { %v3865_v47 = vmul.f32 %v5136_v46, %v3857_v38 }
 0x6de   : > { %v3866_v29 = vmul.f32 %v3865_v47, %v329_v28 }
 0x6e0   : > { %v3867_v55 = vadd.f32 %v3866_v29, %v330_v48 }
 0x6e2   : > { %3868 = vst.msk [vmem:[%s316_s16] sm:$0xff] %vm936_vm15, %v3867_v55 }
 0x6e3 PF: > { %s18_s24 = sadd.s32 1, %s5173_s24  }
 0x6e4   : > { %p15_p2 = scmp.ge.s32.totalorder %s18_s24, 4  }
 0x6e6   :  { %17 = sbr.rel (!%p15_p2) target bundleno = 1 (0x1), region = 92 }
 0x6eb   :  { %3888 = vsyncpa [#allocation3], 1 }
 0x6ec   :  { %3890 = vsyncpa [#allocation3 + $0x1], 1 }

</bundles_post_ra>
